<compile_context>
chip_gen: v6e
topology: v6e:2x2x1
jax: 0.10.0
libtpu: 0.0.40
codegen_flags: <defaults>
</compile_context>

<pallas_src>
import functools

import jax
import jax.numpy as jnp
import numpy as np
from jax.experimental import pallas as pl
from jax.experimental.pallas import tpu as pltpu


# ------------------------------ fused kernel --------------------------------

def _fused_net_kernel(p1_ref, w1_ref, b1_ref, w2_ref, b2_ref,
                      fw1_ref, fb1_ref, fw2_ref, fb2_ref, out_ref):
    """Whole network for one batch tile.

    p1_ref : (TB*576, 25) bf16   conv1 pooled-im2col patches, rows = (b, p, n)
                                 p = 3x3 pool-window pos, n = pooled pos (8x8)
    w1_ref : (25, 32) bf16       conv1 weight (kh*5+kw, c_out)
    b1_ref : (1, 32)  f32
    w2_ref : (25, 32, 64) bf16   conv2 weight (kh*5+kw, c_in, c_out)
    b2_ref : (1, 64)  f32
    fw1_ref: (4, 64, H) bf16     fc1 weight split per pooled position (HWC order)
    fb1_ref: (1, H)   f32
    fw2_ref: (H, 128) bf16       fc2 weight, output padded 10 -> 128 lanes
    fb2_ref: (1, 128) f32
    out_ref: (1, TB, 128) f32
    """
    TB = out_ref.shape[1]

    # ---- conv1: one big MXU matmul over (batch-tile, pool-window, pooled-pos)
    a1 = jnp.dot(p1_ref[...], w1_ref[...],
                 preferred_element_type=jnp.float32)          # (TB*576, 32)
    a1 = a1.reshape(TB, 9, 64, 32)                            # (b, p, n, c)

    # 3x3 max-pool = max over the leading pool-window axis (cheap VPU maxima)
    m = a1[:, 0]
    for p in range(1, 9):
        m = jnp.maximum(m, a1[:, p])                          # (TB, 64, 32)
    y1 = jnp.maximum(m + b1_ref[...], 0.0)                    # bias + relu
    y1 = y1.reshape(TB, 8, 8, 32)                             # (b, h, w, c)

    # ---- conv2: 25 accumulated matmuls, M = TB*32 rows (all 8 w-positions,
    #             valid outputs selected with a sublane slice afterwards)
    acc = None
    for kh in range(5):
        rows = y1[:, kh:kh + 4, :, :]                         # (TB, 4, 8, 32)
        lhs = rows.reshape(TB * 32, 32).astype(jnp.bfloat16)  # tile-aligned merge
        for kw in range(5):
            z = jnp.dot(lhs, w2_ref[kh * 5 + kw],
                        preferred_element_type=jnp.float32)   # (TB*32, 64)
            z = z.reshape(TB, 4, 8, 64)[:, :, kw:kw + 4, :]   # (TB, 4, 4, 64)
            acc = z if acc is None else acc + z
    acc = acc + b2_ref[...]                                   # conv2 bias

    # ---- 2x2 max-pool + relu + fc1 (fc1 weight pre-split into 4 row blocks,
    #      so no 256-wide flatten / transpose is needed)
    h = None
    for i in range(2):
        for j in range(2):
            blk = acc[:, 2 * i:2 * i + 2, 2 * j:2 * j + 2, :]  # (TB, 2, 2, 64)
            f = jnp.maximum(blk[:, 0], blk[:, 1])              # (TB, 2, 64)
            f = jnp.max(f, axis=1)                             # (TB, 64)
            f = jnp.maximum(f, 0.0).astype(jnp.bfloat16)
            d = jnp.dot(f, fw1_ref[i * 2 + j],
                        preferred_element_type=jnp.float32)    # (TB, H)
            h = d if h is None else h + d
    h = jnp.maximum(h + fb1_ref[...], 0.0).astype(jnp.bfloat16)

    # ---- fc2, lane-dense (128-wide, zero-padded) output
    logits = jnp.dot(h, fw2_ref[...],
                     preferred_element_type=jnp.float32) + fb2_ref[...]
    out_ref[0] = logits.astype(out_ref.dtype)


# ------------------------------ wrapper --------------------------------------

def _conv1_patches(x):
    """x: (B, 28, 28) f32 -> pooled im2col patches (B, 9, 64, 25).

    Built with plain XLA slices + stack (no gathers). Row ordering:
    axis1 = pool-window pos (ph*3+pw), axis2 = pooled pos (oh*8+ow),
    axis3 = kernel pos (kh*5+kw); conv input row = 3*oh + ph + kh.
    """
    B = x.shape[0]
    cols = []
    for kh in range(5):
        for kw in range(5):
            cols.append(jax.lax.slice(x, (0, kh, kw), (B, kh + 24, kw + 24)))
    p = jnp.stack(cols, axis=-1)                               # (B, 24, 24, 25)
    p = p.reshape(B, 8, 3, 8, 3, 25).transpose(0, 2, 4, 1, 3, 5)
    return p.reshape(B, 9, 64, 25)


def prep_params(params):
    """One-time re-layout of the PyTorch-style parameters for the kernel."""
    w1, b1, w2, b2, fw1, fb1, fw2, fb2 = params
    H = fw1.shape[1]
    w1k = w1.reshape(25, 32).astype(jnp.bfloat16)
    b1k = b1.reshape(1, 32).astype(jnp.float32)
    w2k = w2.reshape(25, 32, 64).astype(jnp.bfloat16)
    b2k = b2.reshape(1, 64).astype(jnp.float32)
    # fc1: CHW flatten order (c*4 + i*2 + j) -> per-position (i*2+j) blocks of 64
    fw1b = (fw1.reshape(64, 2, 2, H).transpose(1, 2, 0, 3)
            .reshape(4, 64, H).astype(jnp.bfloat16))
    fb1k = fb1.reshape(1, H).astype(jnp.float32)
    # fc2: pad output 10 -> 128 lanes for lane-dense stores
    fw2p = jnp.zeros((H, 128), jnp.float32).at[:, :10].set(fw2).astype(jnp.bfloat16)
    fb2p = jnp.zeros((1, 128), jnp.float32).at[0, :10].set(fb2)
    return (w1k, b1k, w2k, b2k, fw1b, fb1k, fw2p, fb2p)


@functools.partial(jax.jit, static_argnames=("tile_b",))
def net_forward(x_nchw, kparams, tile_b=None):
    w1k, b1k, w2k, b2k, fw1b, fb1k, fw2p, fb2p = kparams
    B = x_nchw.shape[0]
    H = fw1b.shape[2]
    if tile_b is None:
        # >=2 grid steps whenever B >= 2 (lets v7x's two TensorCores both run);
        # on v5e/v6e the grid is serial, so bigger tiles are used for larger B.
        tile_b = 8 if B >= 16 else max(1, B // 2)
    nt = -(-B // tile_b)
    Bp = nt * tile_b

    x = x_nchw.reshape(B, 28, 28)                              # NCHW, C=1
    p1 = _conv1_patches(x)                                     # (B, 9, 64, 25)
    if Bp != B:
        p1 = jnp.pad(p1, ((0, Bp - B), (0, 0), (0, 0), (0, 0)))
    p1 = p1.reshape(Bp * 576, 25).astype(jnp.bfloat16)         # bf16 MXU operand

    out = pl.pallas_call(
        _fused_net_kernel,
        out_shape=jax.ShapeDtypeStruct((nt, tile_b, 128), jnp.float32),
        grid=(nt,),
        in_specs=[
            pl.BlockSpec((tile_b * 576, 25), lambda i: (i, 0)),   # patches
            pl.BlockSpec((25, 32), lambda i: (0, 0)),             # w1
            pl.BlockSpec((1, 32), lambda i: (0, 0)),              # b1
            pl.BlockSpec((25, 32, 64), lambda i: (0, 0, 0)),      # w2
            pl.BlockSpec((1, 64), lambda i: (0, 0)),              # b2
            pl.BlockSpec((4, 64, H), lambda i: (0, 0, 0)),        # fc1 (split)
            pl.BlockSpec((1, H), lambda i: (0, 0)),               # fb1
            pl.BlockSpec((H, 128), lambda i: (0, 0)),             # fc2 (padded)
            pl.BlockSpec((1, 128), lambda i: (0, 0)),             # fb2 (padded)
        ],
        out_specs=pl.BlockSpec((1, tile_b, 128), lambda i: (i, 0, 0)),
        compiler_params=pltpu.CompilerParams(
            dimension_semantics=("parallel",)),
    )(p1, w1k, b1k, w2k, b2k, fw1b, fb1k, fw2p, fb2p)

    return out.reshape(Bp, 128)[:B, :10]


# ------------------------------ params & reference ---------------------------

def init_params(key, nb_hidden):
    ks = jax.random.split(key, 8)

    def u(k, shape, fan_in):
        bound = 1.0 / np.sqrt(fan_in)
        return jax.random.uniform(k, shape, jnp.float32, -bound, bound)

    w1 = u(ks[0], (5, 5, 1, 32), 25)            # HWIO
    b1 = u(ks[1], (32,), 25)
    w2 = u(ks[2], (5, 5, 32, 64), 800)          # HWIO
    b2 = u(ks[3], (64,), 800)
    fw1 = u(ks[4], (256, nb_hidden), 256)
    fb1 = u(ks[5], (nb_hidden,), 256)
    fw2 = u(ks[6], (nb_hidden, 10), nb_hidden)
    fb2 = u(ks[7], (10,), nb_hidden)
    return (w1, b1, w2, b2, fw1, fb1, fw2, fb2)


def reference_forward(x_nchw, params):
    """Pure-JAX (f32, highest precision) reference reproducing the PyTorch net."""
    w1, b1, w2, b2, fw1, fb1, fw2, fb2 = params
    dn = ('NHWC', 'HWIO', 'NHWC')
    hi = jax.lax.Precision.HIGHEST
    x = jnp.transpose(x_nchw, (0, 2, 3, 1))
    y = jax.lax.conv_general_dilated(x, w1, (1, 1), 'VALID',
                                     dimension_numbers=dn, precision=hi) + b1
    y = jax.lax.reduce_window(y, -jnp.inf, jax.lax.max,
                              (1, 3, 3, 1), (1, 3, 3, 1), 'VALID')
    y = jnp.maximum(y, 0.0)
    y = jax.lax.conv_general_dilated(y, w2, (1, 1), 'VALID',
                                     dimension_numbers=dn, precision=hi) + b2
    y = jax.lax.reduce_window(y, -jnp.inf, jax.lax.max,
                              (1, 2, 2, 1), (1, 2, 2, 1), 'VALID')
    y = jnp.maximum(y, 0.0)
    f = jnp.transpose(y, (0, 3, 1, 2)).reshape(y.shape[0], -1)   # CHW flatten
    h = jnp.maximum(jnp.dot(f, fw1, precision=hi) + fb1, 0.0)
    return jnp.dot(h, fw2, precision=hi) + fb2


# ------------------------------ self-test ------------------------------------

if __name__ == "__main__":
    nb_hidden = 64
    key = jax.random.PRNGKey(0)
    kx, kp = jax.random.split(key)
    # x.view(-1, 256) after the conv/pool stack implies 1x28x28 inputs
    x = jax.random.normal(kx, (2, 1, 28, 28), jnp.float32)       # NCHW like PyTorch
    params = init_params(kp, nb_hidden)
    kparams = prep_params(params)

    out = jax.block_until_ready(net_forward(x, kparams))
    assert out.shape == (2, 10), out.shape

    ref = jax.block_until_ready(jax.jit(reference_forward)(x, params))
    # kernel uses bf16 MXU operands with f32 accumulation -> relaxed tolerance
    if not np.allclose(np.asarray(out), np.asarray(ref), rtol=5e-2, atol=2e-2):
        raise AssertionError("Pallas output mismatches pure-JAX reference")
    print("KERNEL_OK")
</pallas_src>

<mosaic_0001>
module attributes {stable_mosaic.version = 11 : i64} {
  func.func @_fused_net_kernel(%arg0: i32, %arg1: memref<576x25xbf16, #tpu.memory_space<vmem>>, %arg2: memref<25x32xbf16, #tpu.memory_space<vmem>>, %arg3: memref<1x32xf32, #tpu.memory_space<vmem>>, %arg4: memref<25x32x64xbf16, #tpu.memory_space<vmem>>, %arg5: memref<1x64xf32, #tpu.memory_space<vmem>>, %arg6: memref<4x64x64xbf16, #tpu.memory_space<vmem>>, %arg7: memref<1x64xf32, #tpu.memory_space<vmem>>, %arg8: memref<64x128xbf16, #tpu.memory_space<vmem>>, %arg9: memref<1x128xf32, #tpu.memory_space<vmem>>, %arg10: memref<1x1x128xf32, #tpu.memory_space<vmem>>) attributes {dimension_semantics = [#tpu.dimension_semantics<parallel>], iteration_bounds = array<i64: 2>, scalar_prefetch = 0 : i64, scratch_operands = 0 : i64, tpu.core_type = #tpu.core_type<tc>, window_params = [{transform_indices = @transform_0, window_bounds = array<i64: 576, 25>}, {pipeline_mode = #tpu.pipeline_mode<synchronous>, transform_indices = @transform_1, window_bounds = array<i64: 25, 32>}, {pipeline_mode = #tpu.pipeline_mode<synchronous>, transform_indices = @transform_2, window_bounds = array<i64: 1, 32>}, {pipeline_mode = #tpu.pipeline_mode<synchronous>, transform_indices = @transform_3, window_bounds = array<i64: 25, 32, 64>}, {pipeline_mode = #tpu.pipeline_mode<synchronous>, transform_indices = @transform_4, window_bounds = array<i64: 1, 64>}, {pipeline_mode = #tpu.pipeline_mode<synchronous>, transform_indices = @transform_5, window_bounds = array<i64: 4, 64, 64>}, {pipeline_mode = #tpu.pipeline_mode<synchronous>, transform_indices = @transform_6, window_bounds = array<i64: 1, 64>}, {pipeline_mode = #tpu.pipeline_mode<synchronous>, transform_indices = @transform_7, window_bounds = array<i64: 64, 128>}, {pipeline_mode = #tpu.pipeline_mode<synchronous>, transform_indices = @transform_8, window_bounds = array<i64: 1, 128>}, {transform_indices = @transform_9, window_bounds = array<i64: 1, 1, 128>}]} {
    %c0 = arith.constant 0 : index
    %c0_0 = arith.constant 0 : index
    %0 = vector.load %arg1[%c0, %c0_0] : memref<576x25xbf16, #tpu.memory_space<vmem>>, vector<576x25xbf16>
    %c0_1 = arith.constant 0 : index
    %c0_2 = arith.constant 0 : index
    %1 = vector.load %arg2[%c0_1, %c0_2] : memref<25x32xbf16, #tpu.memory_space<vmem>>, vector<25x32xbf16>
    %cst = arith.constant dense<0.000000e+00> : vector<576x32xf32>
    %2 = tpu.matmul %0, %1, %cst {dimension_numbers = #tpu.dot_dimension_numbers<[1], [0], [0], [1], [0, 0, 1, 1], [], []>} : vector<576x25xbf16>, vector<25x32xbf16>, vector<576x32xf32> -> vector<576x32xf32>
    %3 = vector.shape_cast %2 : vector<576x32xf32> to vector<1x9x64x32xf32>
    %4 = vector.extract_strided_slice %3 {offsets = [0, 0, 0, 0], sizes = [1, 1, 64, 32], strides = [1, 1, 1, 1]} : vector<1x9x64x32xf32> to vector<1x1x64x32xf32>
    %5 = vector.shape_cast %4 : vector<1x1x64x32xf32> to vector<1x64x32xf32>
    %6 = vector.extract_strided_slice %3 {offsets = [0, 1, 0, 0], sizes = [1, 1, 64, 32], strides = [1, 1, 1, 1]} : vector<1x9x64x32xf32> to vector<1x1x64x32xf32>
    %7 = vector.shape_cast %6 : vector<1x1x64x32xf32> to vector<1x64x32xf32>
    %8 = arith.maximumf %5, %7 : vector<1x64x32xf32>
    %9 = vector.extract_strided_slice %3 {offsets = [0, 2, 0, 0], sizes = [1, 1, 64, 32], strides = [1, 1, 1, 1]} : vector<1x9x64x32xf32> to vector<1x1x64x32xf32>
    %10 = vector.shape_cast %9 : vector<1x1x64x32xf32> to vector<1x64x32xf32>
    %11 = arith.maximumf %8, %10 : vector<1x64x32xf32>
    %12 = vector.extract_strided_slice %3 {offsets = [0, 3, 0, 0], sizes = [1, 1, 64, 32], strides = [1, 1, 1, 1]} : vector<1x9x64x32xf32> to vector<1x1x64x32xf32>
    %13 = vector.shape_cast %12 : vector<1x1x64x32xf32> to vector<1x64x32xf32>
    %14 = arith.maximumf %11, %13 : vector<1x64x32xf32>
    %15 = vector.extract_strided_slice %3 {offsets = [0, 4, 0, 0], sizes = [1, 1, 64, 32], strides = [1, 1, 1, 1]} : vector<1x9x64x32xf32> to vector<1x1x64x32xf32>
    %16 = vector.shape_cast %15 : vector<1x1x64x32xf32> to vector<1x64x32xf32>
    %17 = arith.maximumf %14, %16 : vector<1x64x32xf32>
    %18 = vector.extract_strided_slice %3 {offsets = [0, 5, 0, 0], sizes = [1, 1, 64, 32], strides = [1, 1, 1, 1]} : vector<1x9x64x32xf32> to vector<1x1x64x32xf32>
    %19 = vector.shape_cast %18 : vector<1x1x64x32xf32> to vector<1x64x32xf32>
    %20 = arith.maximumf %17, %19 : vector<1x64x32xf32>
    %21 = vector.extract_strided_slice %3 {offsets = [0, 6, 0, 0], sizes = [1, 1, 64, 32], strides = [1, 1, 1, 1]} : vector<1x9x64x32xf32> to vector<1x1x64x32xf32>
    %22 = vector.shape_cast %21 : vector<1x1x64x32xf32> to vector<1x64x32xf32>
    %23 = arith.maximumf %20, %22 : vector<1x64x32xf32>
    %24 = vector.extract_strided_slice %3 {offsets = [0, 7, 0, 0], sizes = [1, 1, 64, 32], strides = [1, 1, 1, 1]} : vector<1x9x64x32xf32> to vector<1x1x64x32xf32>
    %25 = vector.shape_cast %24 : vector<1x1x64x32xf32> to vector<1x64x32xf32>
    %26 = arith.maximumf %23, %25 : vector<1x64x32xf32>
    %27 = vector.extract_strided_slice %3 {offsets = [0, 8, 0, 0], sizes = [1, 1, 64, 32], strides = [1, 1, 1, 1]} : vector<1x9x64x32xf32> to vector<1x1x64x32xf32>
    %28 = vector.shape_cast %27 : vector<1x1x64x32xf32> to vector<1x64x32xf32>
    %29 = arith.maximumf %26, %28 : vector<1x64x32xf32>
    %c0_3 = arith.constant 0 : index
    %c0_4 = arith.constant 0 : index
    %30 = vector.load %arg3[%c0_3, %c0_4] : memref<1x32xf32, #tpu.memory_space<vmem>>, vector<1x32xf32>
    %31 = vector.shape_cast %30 : vector<1x32xf32> to vector<1x1x32xf32>
    %32 = vector.broadcast %31 : vector<1x1x32xf32> to vector<1x64x32xf32>
    %33 = arith.addf %29, %32 : vector<1x64x32xf32>
    %cst_5 = arith.constant 0.000000e+00 : f32
    %34 = vector.broadcast %cst_5 : f32 to vector<1x64x32xf32>
    %35 = arith.maximumf %33, %34 : vector<1x64x32xf32>
    %36 = vector.shape_cast %35 : vector<1x64x32xf32> to vector<1x8x8x32xf32>
    %37 = vector.extract_strided_slice %36 {offsets = [0, 0, 0, 0], sizes = [1, 4, 8, 32], strides = [1, 1, 1, 1]} : vector<1x8x8x32xf32> to vector<1x4x8x32xf32>
    %38 = vector.shape_cast %37 : vector<1x4x8x32xf32> to vector<32x32xf32>
    %39 = arith.truncf %38 : vector<32x32xf32> to vector<32x32xbf16>
    %c0_6 = arith.constant 0 : index
    %c0_7 = arith.constant 0 : index
    %c0_8 = arith.constant 0 : index
    %40 = vector.load %arg4[%c0_6, %c0_7, %c0_8] : memref<25x32x64xbf16, #tpu.memory_space<vmem>>, vector<1x32x64xbf16>
    %41 = vector.shape_cast %40 : vector<1x32x64xbf16> to vector<32x64xbf16>
    %cst_9 = arith.constant dense<0.000000e+00> : vector<32x64xf32>
    %42 = tpu.matmul %39, %41, %cst_9 {dimension_numbers = #tpu.dot_dimension_numbers<[1], [0], [0], [1], [0, 0, 1, 1], [], []>} : vector<32x32xbf16>, vector<32x64xbf16>, vector<32x64xf32> -> vector<32x64xf32>
    %43 = vector.shape_cast %42 : vector<32x64xf32> to vector<1x4x8x64xf32>
    %44 = vector.extract_strided_slice %43 {offsets = [0, 0, 0, 0], sizes = [1, 4, 4, 64], strides = [1, 1, 1, 1]} : vector<1x4x8x64xf32> to vector<1x4x4x64xf32>
    %c1 = arith.constant 1 : index
    %c0_10 = arith.constant 0 : index
    %c0_11 = arith.constant 0 : index
    %45 = vector.load %arg4[%c1, %c0_10, %c0_11] : memref<25x32x64xbf16, #tpu.memory_space<vmem>>, vector<1x32x64xbf16>
    %46 = vector.shape_cast %45 : vector<1x32x64xbf16> to vector<32x64xbf16>
    %cst_12 = arith.constant dense<0.000000e+00> : vector<32x64xf32>
    %47 = tpu.matmul %39, %46, %cst_12 {dimension_numbers = #tpu.dot_dimension_numbers<[1], [0], [0], [1], [0, 0, 1, 1], [], []>} : vector<32x32xbf16>, vector<32x64xbf16>, vector<32x64xf32> -> vector<32x64xf32>
    %48 = vector.shape_cast %47 : vector<32x64xf32> to vector<1x4x8x64xf32>
    %49 = vector.extract_strided_slice %48 {offsets = [0, 0, 1, 0], sizes = [1, 4, 4, 64], strides = [1, 1, 1, 1]} : vector<1x4x8x64xf32> to vector<1x4x4x64xf32>
    %50 = arith.addf %44, %49 : vector<1x4x4x64xf32>
    %c2 = arith.constant 2 : index
    %c0_13 = arith.constant 0 : index
    %c0_14 = arith.constant 0 : index
    %51 = vector.load %arg4[%c2, %c0_13, %c0_14] : memref<25x32x64xbf16, #tpu.memory_space<vmem>>, vector<1x32x64xbf16>
    %52 = vector.shape_cast %51 : vector<1x32x64xbf16> to vector<32x64xbf16>
    %cst_15 = arith.constant dense<0.000000e+00> : vector<32x64xf32>
    %53 = tpu.matmul %39, %52, %cst_15 {dimension_numbers = #tpu.dot_dimension_numbers<[1], [0], [0], [1], [0, 0, 1, 1], [], []>} : vector<32x32xbf16>, vector<32x64xbf16>, vector<32x64xf32> -> vector<32x64xf32>
    %54 = vector.shape_cast %53 : vector<32x64xf32> to vector<1x4x8x64xf32>
    %55 = vector.extract_strided_slice %54 {offsets = [0, 0, 2, 0], sizes = [1, 4, 4, 64], strides = [1, 1, 1, 1]} : vector<1x4x8x64xf32> to vector<1x4x4x64xf32>
    %56 = arith.addf %50, %55 : vector<1x4x4x64xf32>
    %c3 = arith.constant 3 : index
    %c0_16 = arith.constant 0 : index
    %c0_17 = arith.constant 0 : index
    %57 = vector.load %arg4[%c3, %c0_16, %c0_17] : memref<25x32x64xbf16, #tpu.memory_space<vmem>>, vector<1x32x64xbf16>
    %58 = vector.shape_cast %57 : vector<1x32x64xbf16> to vector<32x64xbf16>
    %cst_18 = arith.constant dense<0.000000e+00> : vector<32x64xf32>
    %59 = tpu.matmul %39, %58, %cst_18 {dimension_numbers = #tpu.dot_dimension_numbers<[1], [0], [0], [1], [0, 0, 1, 1], [], []>} : vector<32x32xbf16>, vector<32x64xbf16>, vector<32x64xf32> -> vector<32x64xf32>
    %60 = vector.shape_cast %59 : vector<32x64xf32> to vector<1x4x8x64xf32>
    %61 = vector.extract_strided_slice %60 {offsets = [0, 0, 3, 0], sizes = [1, 4, 4, 64], strides = [1, 1, 1, 1]} : vector<1x4x8x64xf32> to vector<1x4x4x64xf32>
    %62 = arith.addf %56, %61 : vector<1x4x4x64xf32>
    %c4 = arith.constant 4 : index
    %c0_19 = arith.constant 0 : index
    %c0_20 = arith.constant 0 : index
    %63 = vector.load %arg4[%c4, %c0_19, %c0_20] : memref<25x32x64xbf16, #tpu.memory_space<vmem>>, vector<1x32x64xbf16>
    %64 = vector.shape_cast %63 : vector<1x32x64xbf16> to vector<32x64xbf16>
    %cst_21 = arith.constant dense<0.000000e+00> : vector<32x64xf32>
    %65 = tpu.matmul %39, %64, %cst_21 {dimension_numbers = #tpu.dot_dimension_numbers<[1], [0], [0], [1], [0, 0, 1, 1], [], []>} : vector<32x32xbf16>, vector<32x64xbf16>, vector<32x64xf32> -> vector<32x64xf32>
    %66 = vector.shape_cast %65 : vector<32x64xf32> to vector<1x4x8x64xf32>
    %67 = vector.extract_strided_slice %66 {offsets = [0, 0, 4, 0], sizes = [1, 4, 4, 64], strides = [1, 1, 1, 1]} : vector<1x4x8x64xf32> to vector<1x4x4x64xf32>
    %68 = arith.addf %62, %67 : vector<1x4x4x64xf32>
    %69 = vector.extract_strided_slice %36 {offsets = [0, 1, 0, 0], sizes = [1, 4, 8, 32], strides = [1, 1, 1, 1]} : vector<1x8x8x32xf32> to vector<1x4x8x32xf32>
    %70 = vector.shape_cast %69 : vector<1x4x8x32xf32> to vector<32x32xf32>
    %71 = arith.truncf %70 : vector<32x32xf32> to vector<32x32xbf16>
    %c5 = arith.constant 5 : index
    %c0_22 = arith.constant 0 : index
    %c0_23 = arith.constant 0 : index
    %72 = vector.load %arg4[%c5, %c0_22, %c0_23] : memref<25x32x64xbf16, #tpu.memory_space<vmem>>, vector<1x32x64xbf16>
    %73 = vector.shape_cast %72 : vector<1x32x64xbf16> to vector<32x64xbf16>
    %cst_24 = arith.constant dense<0.000000e+00> : vector<32x64xf32>
    %74 = tpu.matmul %71, %73, %cst_24 {dimension_numbers = #tpu.dot_dimension_numbers<[1], [0], [0], [1], [0, 0, 1, 1], [], []>} : vector<32x32xbf16>, vector<32x64xbf16>, vector<32x64xf32> -> vector<32x64xf32>
    %75 = vector.shape_cast %74 : vector<32x64xf32> to vector<1x4x8x64xf32>
    %76 = vector.extract_strided_slice %75 {offsets = [0, 0, 0, 0], sizes = [1, 4, 4, 64], strides = [1, 1, 1, 1]} : vector<1x4x8x64xf32> to vector<1x4x4x64xf32>
    %77 = arith.addf %68, %76 : vector<1x4x4x64xf32>
    %c6 = arith.constant 6 : index
    %c0_25 = arith.constant 0 : index
    %c0_26 = arith.constant 0 : index
    %78 = vector.load %arg4[%c6, %c0_25, %c0_26] : memref<25x32x64xbf16, #tpu.memory_space<vmem>>, vector<1x32x64xbf16>
    %79 = vector.shape_cast %78 : vector<1x32x64xbf16> to vector<32x64xbf16>
    %cst_27 = arith.constant dense<0.000000e+00> : vector<32x64xf32>
    %80 = tpu.matmul %71, %79, %cst_27 {dimension_numbers = #tpu.dot_dimension_numbers<[1], [0], [0], [1], [0, 0, 1, 1], [], []>} : vector<32x32xbf16>, vector<32x64xbf16>, vector<32x64xf32> -> vector<32x64xf32>
    %81 = vector.shape_cast %80 : vector<32x64xf32> to vector<1x4x8x64xf32>
    %82 = vector.extract_strided_slice %81 {offsets = [0, 0, 1, 0], sizes = [1, 4, 4, 64], strides = [1, 1, 1, 1]} : vector<1x4x8x64xf32> to vector<1x4x4x64xf32>
    %83 = arith.addf %77, %82 : vector<1x4x4x64xf32>
    %c7 = arith.constant 7 : index
    %c0_28 = arith.constant 0 : index
    %c0_29 = arith.constant 0 : index
    %84 = vector.load %arg4[%c7, %c0_28, %c0_29] : memref<25x32x64xbf16, #tpu.memory_space<vmem>>, vector<1x32x64xbf16>
    %85 = vector.shape_cast %84 : vector<1x32x64xbf16> to vector<32x64xbf16>
    %cst_30 = arith.constant dense<0.000000e+00> : vector<32x64xf32>
    %86 = tpu.matmul %71, %85, %cst_30 {dimension_numbers = #tpu.dot_dimension_numbers<[1], [0], [0], [1], [0, 0, 1, 1], [], []>} : vector<32x32xbf16>, vector<32x64xbf16>, vector<32x64xf32> -> vector<32x64xf32>
    %87 = vector.shape_cast %86 : vector<32x64xf32> to vector<1x4x8x64xf32>
    %88 = vector.extract_strided_slice %87 {offsets = [0, 0, 2, 0], sizes = [1, 4, 4, 64], strides = [1, 1, 1, 1]} : vector<1x4x8x64xf32> to vector<1x4x4x64xf32>
    %89 = arith.addf %83, %88 : vector<1x4x4x64xf32>
    %c8 = arith.constant 8 : index
    %c0_31 = arith.constant 0 : index
    %c0_32 = arith.constant 0 : index
    %90 = vector.load %arg4[%c8, %c0_31, %c0_32] : memref<25x32x64xbf16, #tpu.memory_space<vmem>>, vector<1x32x64xbf16>
    %91 = vector.shape_cast %90 : vector<1x32x64xbf16> to vector<32x64xbf16>
    %cst_33 = arith.constant dense<0.000000e+00> : vector<32x64xf32>
    %92 = tpu.matmul %71, %91, %cst_33 {dimension_numbers = #tpu.dot_dimension_numbers<[1], [0], [0], [1], [0, 0, 1, 1], [], []>} : vector<32x32xbf16>, vector<32x64xbf16>, vector<32x64xf32> -> vector<32x64xf32>
    %93 = vector.shape_cast %92 : vector<32x64xf32> to vector<1x4x8x64xf32>
    %94 = vector.extract_strided_slice %93 {offsets = [0, 0, 3, 0], sizes = [1, 4, 4, 64], strides = [1, 1, 1, 1]} : vector<1x4x8x64xf32> to vector<1x4x4x64xf32>
    %95 = arith.addf %89, %94 : vector<1x4x4x64xf32>
    %c9 = arith.constant 9 : index
    %c0_34 = arith.constant 0 : index
    %c0_35 = arith.constant 0 : index
    %96 = vector.load %arg4[%c9, %c0_34, %c0_35] : memref<25x32x64xbf16, #tpu.memory_space<vmem>>, vector<1x32x64xbf16>
    %97 = vector.shape_cast %96 : vector<1x32x64xbf16> to vector<32x64xbf16>
    %cst_36 = arith.constant dense<0.000000e+00> : vector<32x64xf32>
    %98 = tpu.matmul %71, %97, %cst_36 {dimension_numbers = #tpu.dot_dimension_numbers<[1], [0], [0], [1], [0, 0, 1, 1], [], []>} : vector<32x32xbf16>, vector<32x64xbf16>, vector<32x64xf32> -> vector<32x64xf32>
    %99 = vector.shape_cast %98 : vector<32x64xf32> to vector<1x4x8x64xf32>
    %100 = vector.extract_strided_slice %99 {offsets = [0, 0, 4, 0], sizes = [1, 4, 4, 64], strides = [1, 1, 1, 1]} : vector<1x4x8x64xf32> to vector<1x4x4x64xf32>
    %101 = arith.addf %95, %100 : vector<1x4x4x64xf32>
    %102 = vector.extract_strided_slice %36 {offsets = [0, 2, 0, 0], sizes = [1, 4, 8, 32], strides = [1, 1, 1, 1]} : vector<1x8x8x32xf32> to vector<1x4x8x32xf32>
    %103 = vector.shape_cast %102 : vector<1x4x8x32xf32> to vector<32x32xf32>
    %104 = arith.truncf %103 : vector<32x32xf32> to vector<32x32xbf16>
    %c10 = arith.constant 10 : index
    %c0_37 = arith.constant 0 : index
    %c0_38 = arith.constant 0 : index
    %105 = vector.load %arg4[%c10, %c0_37, %c0_38] : memref<25x32x64xbf16, #tpu.memory_space<vmem>>, vector<1x32x64xbf16>
    %106 = vector.shape_cast %105 : vector<1x32x64xbf16> to vector<32x64xbf16>
    %cst_39 = arith.constant dense<0.000000e+00> : vector<32x64xf32>
    %107 = tpu.matmul %104, %106, %cst_39 {dimension_numbers = #tpu.dot_dimension_numbers<[1], [0], [0], [1], [0, 0, 1, 1], [], []>} : vector<32x32xbf16>, vector<32x64xbf16>, vector<32x64xf32> -> vector<32x64xf32>
    %108 = vector.shape_cast %107 : vector<32x64xf32> to vector<1x4x8x64xf32>
    %109 = vector.extract_strided_slice %108 {offsets = [0, 0, 0, 0], sizes = [1, 4, 4, 64], strides = [1, 1, 1, 1]} : vector<1x4x8x64xf32> to vector<1x4x4x64xf32>
    %110 = arith.addf %101, %109 : vector<1x4x4x64xf32>
    %c11 = arith.constant 11 : index
    %c0_40 = arith.constant 0 : index
    %c0_41 = arith.constant 0 : index
    %111 = vector.load %arg4[%c11, %c0_40, %c0_41] : memref<25x32x64xbf16, #tpu.memory_space<vmem>>, vector<1x32x64xbf16>
    %112 = vector.shape_cast %111 : vector<1x32x64xbf16> to vector<32x64xbf16>
    %cst_42 = arith.constant dense<0.000000e+00> : vector<32x64xf32>
    %113 = tpu.matmul %104, %112, %cst_42 {dimension_numbers = #tpu.dot_dimension_numbers<[1], [0], [0], [1], [0, 0, 1, 1], [], []>} : vector<32x32xbf16>, vector<32x64xbf16>, vector<32x64xf32> -> vector<32x64xf32>
    %114 = vector.shape_cast %113 : vector<32x64xf32> to vector<1x4x8x64xf32>
    %115 = vector.extract_strided_slice %114 {offsets = [0, 0, 1, 0], sizes = [1, 4, 4, 64], strides = [1, 1, 1, 1]} : vector<1x4x8x64xf32> to vector<1x4x4x64xf32>
    %116 = arith.addf %110, %115 : vector<1x4x4x64xf32>
    %c12 = arith.constant 12 : index
    %c0_43 = arith.constant 0 : index
    %c0_44 = arith.constant 0 : index
    %117 = vector.load %arg4[%c12, %c0_43, %c0_44] : memref<25x32x64xbf16, #tpu.memory_space<vmem>>, vector<1x32x64xbf16>
    %118 = vector.shape_cast %117 : vector<1x32x64xbf16> to vector<32x64xbf16>
    %cst_45 = arith.constant dense<0.000000e+00> : vector<32x64xf32>
    %119 = tpu.matmul %104, %118, %cst_45 {dimension_numbers = #tpu.dot_dimension_numbers<[1], [0], [0], [1], [0, 0, 1, 1], [], []>} : vector<32x32xbf16>, vector<32x64xbf16>, vector<32x64xf32> -> vector<32x64xf32>
    %120 = vector.shape_cast %119 : vector<32x64xf32> to vector<1x4x8x64xf32>
    %121 = vector.extract_strided_slice %120 {offsets = [0, 0, 2, 0], sizes = [1, 4, 4, 64], strides = [1, 1, 1, 1]} : vector<1x4x8x64xf32> to vector<1x4x4x64xf32>
    %122 = arith.addf %116, %121 : vector<1x4x4x64xf32>
    %c13 = arith.constant 13 : index
    %c0_46 = arith.constant 0 : index
    %c0_47 = arith.constant 0 : index
    %123 = vector.load %arg4[%c13, %c0_46, %c0_47] : memref<25x32x64xbf16, #tpu.memory_space<vmem>>, vector<1x32x64xbf16>
    %124 = vector.shape_cast %123 : vector<1x32x64xbf16> to vector<32x64xbf16>
    %cst_48 = arith.constant dense<0.000000e+00> : vector<32x64xf32>
    %125 = tpu.matmul %104, %124, %cst_48 {dimension_numbers = #tpu.dot_dimension_numbers<[1], [0], [0], [1], [0, 0, 1, 1], [], []>} : vector<32x32xbf16>, vector<32x64xbf16>, vector<32x64xf32> -> vector<32x64xf32>
    %126 = vector.shape_cast %125 : vector<32x64xf32> to vector<1x4x8x64xf32>
    %127 = vector.extract_strided_slice %126 {offsets = [0, 0, 3, 0], sizes = [1, 4, 4, 64], strides = [1, 1, 1, 1]} : vector<1x4x8x64xf32> to vector<1x4x4x64xf32>
    %128 = arith.addf %122, %127 : vector<1x4x4x64xf32>
    %c14 = arith.constant 14 : index
    %c0_49 = arith.constant 0 : index
    %c0_50 = arith.constant 0 : index
    %129 = vector.load %arg4[%c14, %c0_49, %c0_50] : memref<25x32x64xbf16, #tpu.memory_space<vmem>>, vector<1x32x64xbf16>
    %130 = vector.shape_cast %129 : vector<1x32x64xbf16> to vector<32x64xbf16>
    %cst_51 = arith.constant dense<0.000000e+00> : vector<32x64xf32>
    %131 = tpu.matmul %104, %130, %cst_51 {dimension_numbers = #tpu.dot_dimension_numbers<[1], [0], [0], [1], [0, 0, 1, 1], [], []>} : vector<32x32xbf16>, vector<32x64xbf16>, vector<32x64xf32> -> vector<32x64xf32>
    %132 = vector.shape_cast %131 : vector<32x64xf32> to vector<1x4x8x64xf32>
    %133 = vector.extract_strided_slice %132 {offsets = [0, 0, 4, 0], sizes = [1, 4, 4, 64], strides = [1, 1, 1, 1]} : vector<1x4x8x64xf32> to vector<1x4x4x64xf32>
    %134 = arith.addf %128, %133 : vector<1x4x4x64xf32>
    %135 = vector.extract_strided_slice %36 {offsets = [0, 3, 0, 0], sizes = [1, 4, 8, 32], strides = [1, 1, 1, 1]} : vector<1x8x8x32xf32> to vector<1x4x8x32xf32>
    %136 = vector.shape_cast %135 : vector<1x4x8x32xf32> to vector<32x32xf32>
    %137 = arith.truncf %136 : vector<32x32xf32> to vector<32x32xbf16>
    %c15 = arith.constant 15 : index
    %c0_52 = arith.constant 0 : index
    %c0_53 = arith.constant 0 : index
    %138 = vector.load %arg4[%c15, %c0_52, %c0_53] : memref<25x32x64xbf16, #tpu.memory_space<vmem>>, vector<1x32x64xbf16>
    %139 = vector.shape_cast %138 : vector<1x32x64xbf16> to vector<32x64xbf16>
    %cst_54 = arith.constant dense<0.000000e+00> : vector<32x64xf32>
    %140 = tpu.matmul %137, %139, %cst_54 {dimension_numbers = #tpu.dot_dimension_numbers<[1], [0], [0], [1], [0, 0, 1, 1], [], []>} : vector<32x32xbf16>, vector<32x64xbf16>, vector<32x64xf32> -> vector<32x64xf32>
    %141 = vector.shape_cast %140 : vector<32x64xf32> to vector<1x4x8x64xf32>
    %142 = vector.extract_strided_slice %141 {offsets = [0, 0, 0, 0], sizes = [1, 4, 4, 64], strides = [1, 1, 1, 1]} : vector<1x4x8x64xf32> to vector<1x4x4x64xf32>
    %143 = arith.addf %134, %142 : vector<1x4x4x64xf32>
    %c16 = arith.constant 16 : index
    %c0_55 = arith.constant 0 : index
    %c0_56 = arith.constant 0 : index
    %144 = vector.load %arg4[%c16, %c0_55, %c0_56] : memref<25x32x64xbf16, #tpu.memory_space<vmem>>, vector<1x32x64xbf16>
    %145 = vector.shape_cast %144 : vector<1x32x64xbf16> to vector<32x64xbf16>
    %cst_57 = arith.constant dense<0.000000e+00> : vector<32x64xf32>
    %146 = tpu.matmul %137, %145, %cst_57 {dimension_numbers = #tpu.dot_dimension_numbers<[1], [0], [0], [1], [0, 0, 1, 1], [], []>} : vector<32x32xbf16>, vector<32x64xbf16>, vector<32x64xf32> -> vector<32x64xf32>
    %147 = vector.shape_cast %146 : vector<32x64xf32> to vector<1x4x8x64xf32>
    %148 = vector.extract_strided_slice %147 {offsets = [0, 0, 1, 0], sizes = [1, 4, 4, 64], strides = [1, 1, 1, 1]} : vector<1x4x8x64xf32> to vector<1x4x4x64xf32>
    %149 = arith.addf %143, %148 : vector<1x4x4x64xf32>
    %c17 = arith.constant 17 : index
    %c0_58 = arith.constant 0 : index
    %c0_59 = arith.constant 0 : index
    %150 = vector.load %arg4[%c17, %c0_58, %c0_59] : memref<25x32x64xbf16, #tpu.memory_space<vmem>>, vector<1x32x64xbf16>
    %151 = vector.shape_cast %150 : vector<1x32x64xbf16> to vector<32x64xbf16>
    %cst_60 = arith.constant dense<0.000000e+00> : vector<32x64xf32>
    %152 = tpu.matmul %137, %151, %cst_60 {dimension_numbers = #tpu.dot_dimension_numbers<[1], [0], [0], [1], [0, 0, 1, 1], [], []>} : vector<32x32xbf16>, vector<32x64xbf16>, vector<32x64xf32> -> vector<32x64xf32>
    %153 = vector.shape_cast %152 : vector<32x64xf32> to vector<1x4x8x64xf32>
    %154 = vector.extract_strided_slice %153 {offsets = [0, 0, 2, 0], sizes = [1, 4, 4, 64], strides = [1, 1, 1, 1]} : vector<1x4x8x64xf32> to vector<1x4x4x64xf32>
    %155 = arith.addf %149, %154 : vector<1x4x4x64xf32>
    %c18 = arith.constant 18 : index
    %c0_61 = arith.constant 0 : index
    %c0_62 = arith.constant 0 : index
    %156 = vector.load %arg4[%c18, %c0_61, %c0_62] : memref<25x32x64xbf16, #tpu.memory_space<vmem>>, vector<1x32x64xbf16>
    %157 = vector.shape_cast %156 : vector<1x32x64xbf16> to vector<32x64xbf16>
    %cst_63 = arith.constant dense<0.000000e+00> : vector<32x64xf32>
    %158 = tpu.matmul %137, %157, %cst_63 {dimension_numbers = #tpu.dot_dimension_numbers<[1], [0], [0], [1], [0, 0, 1, 1], [], []>} : vector<32x32xbf16>, vector<32x64xbf16>, vector<32x64xf32> -> vector<32x64xf32>
    %159 = vector.shape_cast %158 : vector<32x64xf32> to vector<1x4x8x64xf32>
    %160 = vector.extract_strided_slice %159 {offsets = [0, 0, 3, 0], sizes = [1, 4, 4, 64], strides = [1, 1, 1, 1]} : vector<1x4x8x64xf32> to vector<1x4x4x64xf32>
    %161 = arith.addf %155, %160 : vector<1x4x4x64xf32>
    %c19 = arith.constant 19 : index
    %c0_64 = arith.constant 0 : index
    %c0_65 = arith.constant 0 : index
    %162 = vector.load %arg4[%c19, %c0_64, %c0_65] : memref<25x32x64xbf16, #tpu.memory_space<vmem>>, vector<1x32x64xbf16>
    %163 = vector.shape_cast %162 : vector<1x32x64xbf16> to vector<32x64xbf16>
    %cst_66 = arith.constant dense<0.000000e+00> : vector<32x64xf32>
    %164 = tpu.matmul %137, %163, %cst_66 {dimension_numbers = #tpu.dot_dimension_numbers<[1], [0], [0], [1], [0, 0, 1, 1], [], []>} : vector<32x32xbf16>, vector<32x64xbf16>, vector<32x64xf32> -> vector<32x64xf32>
    %165 = vector.shape_cast %164 : vector<32x64xf32> to vector<1x4x8x64xf32>
    %166 = vector.extract_strided_slice %165 {offsets = [0, 0, 4, 0], sizes = [1, 4, 4, 64], strides = [1, 1, 1, 1]} : vector<1x4x8x64xf32> to vector<1x4x4x64xf32>
    %167 = arith.addf %161, %166 : vector<1x4x4x64xf32>
    %168 = vector.extract_strided_slice %36 {offsets = [0, 4, 0, 0], sizes = [1, 4, 8, 32], strides = [1, 1, 1, 1]} : vector<1x8x8x32xf32> to vector<1x4x8x32xf32>
    %169 = vector.shape_cast %168 : vector<1x4x8x32xf32> to vector<32x32xf32>
    %170 = arith.truncf %169 : vector<32x32xf32> to vector<32x32xbf16>
    %c20 = arith.constant 20 : index
    %c0_67 = arith.constant 0 : index
    %c0_68 = arith.constant 0 : index
    %171 = vector.load %arg4[%c20, %c0_67, %c0_68] : memref<25x32x64xbf16, #tpu.memory_space<vmem>>, vector<1x32x64xbf16>
    %172 = vector.shape_cast %171 : vector<1x32x64xbf16> to vector<32x64xbf16>
    %cst_69 = arith.constant dense<0.000000e+00> : vector<32x64xf32>
    %173 = tpu.matmul %170, %172, %cst_69 {dimension_numbers = #tpu.dot_dimension_numbers<[1], [0], [0], [1], [0, 0, 1, 1], [], []>} : vector<32x32xbf16>, vector<32x64xbf16>, vector<32x64xf32> -> vector<32x64xf32>
    %174 = vector.shape_cast %173 : vector<32x64xf32> to vector<1x4x8x64xf32>
    %175 = vector.extract_strided_slice %174 {offsets = [0, 0, 0, 0], sizes = [1, 4, 4, 64], strides = [1, 1, 1, 1]} : vector<1x4x8x64xf32> to vector<1x4x4x64xf32>
    %176 = arith.addf %167, %175 : vector<1x4x4x64xf32>
    %c21 = arith.constant 21 : index
    %c0_70 = arith.constant 0 : index
    %c0_71 = arith.constant 0 : index
    %177 = vector.load %arg4[%c21, %c0_70, %c0_71] : memref<25x32x64xbf16, #tpu.memory_space<vmem>>, vector<1x32x64xbf16>
    %178 = vector.shape_cast %177 : vector<1x32x64xbf16> to vector<32x64xbf16>
    %cst_72 = arith.constant dense<0.000000e+00> : vector<32x64xf32>
    %179 = tpu.matmul %170, %178, %cst_72 {dimension_numbers = #tpu.dot_dimension_numbers<[1], [0], [0], [1], [0, 0, 1, 1], [], []>} : vector<32x32xbf16>, vector<32x64xbf16>, vector<32x64xf32> -> vector<32x64xf32>
    %180 = vector.shape_cast %179 : vector<32x64xf32> to vector<1x4x8x64xf32>
    %181 = vector.extract_strided_slice %180 {offsets = [0, 0, 1, 0], sizes = [1, 4, 4, 64], strides = [1, 1, 1, 1]} : vector<1x4x8x64xf32> to vector<1x4x4x64xf32>
    %182 = arith.addf %176, %181 : vector<1x4x4x64xf32>
    %c22 = arith.constant 22 : index
    %c0_73 = arith.constant 0 : index
    %c0_74 = arith.constant 0 : index
    %183 = vector.load %arg4[%c22, %c0_73, %c0_74] : memref<25x32x64xbf16, #tpu.memory_space<vmem>>, vector<1x32x64xbf16>
    %184 = vector.shape_cast %183 : vector<1x32x64xbf16> to vector<32x64xbf16>
    %cst_75 = arith.constant dense<0.000000e+00> : vector<32x64xf32>
    %185 = tpu.matmul %170, %184, %cst_75 {dimension_numbers = #tpu.dot_dimension_numbers<[1], [0], [0], [1], [0, 0, 1, 1], [], []>} : vector<32x32xbf16>, vector<32x64xbf16>, vector<32x64xf32> -> vector<32x64xf32>
    %186 = vector.shape_cast %185 : vector<32x64xf32> to vector<1x4x8x64xf32>
    %187 = vector.extract_strided_slice %186 {offsets = [0, 0, 2, 0], sizes = [1, 4, 4, 64], strides = [1, 1, 1, 1]} : vector<1x4x8x64xf32> to vector<1x4x4x64xf32>
    %188 = arith.addf %182, %187 : vector<1x4x4x64xf32>
    %c23 = arith.constant 23 : index
    %c0_76 = arith.constant 0 : index
    %c0_77 = arith.constant 0 : index
    %189 = vector.load %arg4[%c23, %c0_76, %c0_77] : memref<25x32x64xbf16, #tpu.memory_space<vmem>>, vector<1x32x64xbf16>
    %190 = vector.shape_cast %189 : vector<1x32x64xbf16> to vector<32x64xbf16>
    %cst_78 = arith.constant dense<0.000000e+00> : vector<32x64xf32>
    %191 = tpu.matmul %170, %190, %cst_78 {dimension_numbers = #tpu.dot_dimension_numbers<[1], [0], [0], [1], [0, 0, 1, 1], [], []>} : vector<32x32xbf16>, vector<32x64xbf16>, vector<32x64xf32> -> vector<32x64xf32>
    %192 = vector.shape_cast %191 : vector<32x64xf32> to vector<1x4x8x64xf32>
    %193 = vector.extract_strided_slice %192 {offsets = [0, 0, 3, 0], sizes = [1, 4, 4, 64], strides = [1, 1, 1, 1]} : vector<1x4x8x64xf32> to vector<1x4x4x64xf32>
    %194 = arith.addf %188, %193 : vector<1x4x4x64xf32>
    %c24 = arith.constant 24 : index
    %c0_79 = arith.constant 0 : index
    %c0_80 = arith.constant 0 : index
    %195 = vector.load %arg4[%c24, %c0_79, %c0_80] : memref<25x32x64xbf16, #tpu.memory_space<vmem>>, vector<1x32x64xbf16>
    %196 = vector.shape_cast %195 : vector<1x32x64xbf16> to vector<32x64xbf16>
    %cst_81 = arith.constant dense<0.000000e+00> : vector<32x64xf32>
    %197 = tpu.matmul %170, %196, %cst_81 {dimension_numbers = #tpu.dot_dimension_numbers<[1], [0], [0], [1], [0, 0, 1, 1], [], []>} : vector<32x32xbf16>, vector<32x64xbf16>, vector<32x64xf32> -> vector<32x64xf32>
    %198 = vector.shape_cast %197 : vector<32x64xf32> to vector<1x4x8x64xf32>
    %199 = vector.extract_strided_slice %198 {offsets = [0, 0, 4, 0], sizes = [1, 4, 4, 64], strides = [1, 1, 1, 1]} : vector<1x4x8x64xf32> to vector<1x4x4x64xf32>
    %200 = arith.addf %194, %199 : vector<1x4x4x64xf32>
    %c0_82 = arith.constant 0 : index
    %c0_83 = arith.constant 0 : index
    %201 = vector.load %arg5[%c0_82, %c0_83] : memref<1x64xf32, #tpu.memory_space<vmem>>, vector<1x64xf32>
    %202 = vector.shape_cast %201 : vector<1x64xf32> to vector<1x1x1x64xf32>
    %203 = vector.broadcast %202 : vector<1x1x1x64xf32> to vector<1x4x4x64xf32>
    %204 = arith.addf %200, %203 : vector<1x4x4x64xf32>
    %205 = vector.extract_strided_slice %204 {offsets = [0, 0, 0, 0], sizes = [1, 2, 2, 64], strides = [1, 1, 1, 1]} : vector<1x4x4x64xf32> to vector<1x2x2x64xf32>
    %206 = vector.extract_strided_slice %205 {offsets = [0, 0, 0, 0], sizes = [1, 1, 2, 64], strides = [1, 1, 1, 1]} : vector<1x2x2x64xf32> to vector<1x1x2x64xf32>
    %207 = vector.shape_cast %206 : vector<1x1x2x64xf32> to vector<1x2x64xf32>
    %208 = vector.extract_strided_slice %205 {offsets = [0, 1, 0, 0], sizes = [1, 1, 2, 64], strides = [1, 1, 1, 1]} : vector<1x2x2x64xf32> to vector<1x1x2x64xf32>
    %209 = vector.shape_cast %208 : vector<1x1x2x64xf32> to vector<1x2x64xf32>
    %210 = arith.maximumf %207, %209 : vector<1x2x64xf32>
    %cst_84 = arith.constant dense<0xFF800000> : vector<1x64xf32>
    %211 = vector.multi_reduction <maximumf>, %210, %cst_84 [1] : vector<1x2x64xf32> to vector<1x64xf32>
    %cst_85 = arith.constant 0.000000e+00 : f32
    %212 = vector.broadcast %cst_85 : f32 to vector<1x64xf32>
    %213 = arith.maximumf %211, %212 : vector<1x64xf32>
    %214 = arith.truncf %213 : vector<1x64xf32> to vector<1x64xbf16>
    %c0_86 = arith.constant 0 : index
    %c0_87 = arith.constant 0 : index
    %c0_88 = arith.constant 0 : index
    %215 = vector.load %arg6[%c0_86, %c0_87, %c0_88] : memref<4x64x64xbf16, #tpu.memory_space<vmem>>, vector<1x64x64xbf16>
    %216 = vector.shape_cast %215 : vector<1x64x64xbf16> to vector<64x64xbf16>
    %cst_89 = arith.constant dense<0.000000e+00> : vector<1x64xf32>
    %217 = tpu.matmul %214, %216, %cst_89 {dimension_numbers = #tpu.dot_dimension_numbers<[1], [0], [0], [1], [0, 0, 1, 1], [], []>} : vector<1x64xbf16>, vector<64x64xbf16>, vector<1x64xf32> -> vector<1x64xf32>
    %218 = vector.extract_strided_slice %204 {offsets = [0, 0, 2, 0], sizes = [1, 2, 2, 64], strides = [1, 1, 1, 1]} : vector<1x4x4x64xf32> to vector<1x2x2x64xf32>
    %219 = vector.extract_strided_slice %218 {offsets = [0, 0, 0, 0], sizes = [1, 1, 2, 64], strides = [1, 1, 1, 1]} : vector<1x2x2x64xf32> to vector<1x1x2x64xf32>
    %220 = vector.shape_cast %219 : vector<1x1x2x64xf32> to vector<1x2x64xf32>
    %221 = vector.extract_strided_slice %218 {offsets = [0, 1, 0, 0], sizes = [1, 1, 2, 64], strides = [1, 1, 1, 1]} : vector<1x2x2x64xf32> to vector<1x1x2x64xf32>
    %222 = vector.shape_cast %221 : vector<1x1x2x64xf32> to vector<1x2x64xf32>
    %223 = arith.maximumf %220, %222 : vector<1x2x64xf32>
    %cst_90 = arith.constant dense<0xFF800000> : vector<1x64xf32>
    %224 = vector.multi_reduction <maximumf>, %223, %cst_90 [1] : vector<1x2x64xf32> to vector<1x64xf32>
    %cst_91 = arith.constant 0.000000e+00 : f32
    %225 = vector.broadcast %cst_91 : f32 to vector<1x64xf32>
    %226 = arith.maximumf %224, %225 : vector<1x64xf32>
    %227 = arith.truncf %226 : vector<1x64xf32> to vector<1x64xbf16>
    %c1_92 = arith.constant 1 : index
    %c0_93 = arith.constant 0 : index
    %c0_94 = arith.constant 0 : index
    %228 = vector.load %arg6[%c1_92, %c0_93, %c0_94] : memref<4x64x64xbf16, #tpu.memory_space<vmem>>, vector<1x64x64xbf16>
    %229 = vector.shape_cast %228 : vector<1x64x64xbf16> to vector<64x64xbf16>
    %cst_95 = arith.constant dense<0.000000e+00> : vector<1x64xf32>
    %230 = tpu.matmul %227, %229, %cst_95 {dimension_numbers = #tpu.dot_dimension_numbers<[1], [0], [0], [1], [0, 0, 1, 1], [], []>} : vector<1x64xbf16>, vector<64x64xbf16>, vector<1x64xf32> -> vector<1x64xf32>
    %231 = arith.addf %217, %230 : vector<1x64xf32>
    %232 = vector.extract_strided_slice %204 {offsets = [0, 2, 0, 0], sizes = [1, 2, 2, 64], strides = [1, 1, 1, 1]} : vector<1x4x4x64xf32> to vector<1x2x2x64xf32>
    %233 = vector.extract_strided_slice %232 {offsets = [0, 0, 0, 0], sizes = [1, 1, 2, 64], strides = [1, 1, 1, 1]} : vector<1x2x2x64xf32> to vector<1x1x2x64xf32>
    %234 = vector.shape_cast %233 : vector<1x1x2x64xf32> to vector<1x2x64xf32>
    %235 = vector.extract_strided_slice %232 {offsets = [0, 1, 0, 0], sizes = [1, 1, 2, 64], strides = [1, 1, 1, 1]} : vector<1x2x2x64xf32> to vector<1x1x2x64xf32>
    %236 = vector.shape_cast %235 : vector<1x1x2x64xf32> to vector<1x2x64xf32>
    %237 = arith.maximumf %234, %236 : vector<1x2x64xf32>
    %cst_96 = arith.constant dense<0xFF800000> : vector<1x64xf32>
    %238 = vector.multi_reduction <maximumf>, %237, %cst_96 [1] : vector<1x2x64xf32> to vector<1x64xf32>
    %cst_97 = arith.constant 0.000000e+00 : f32
    %239 = vector.broadcast %cst_97 : f32 to vector<1x64xf32>
    %240 = arith.maximumf %238, %239 : vector<1x64xf32>
    %241 = arith.truncf %240 : vector<1x64xf32> to vector<1x64xbf16>
    %c2_98 = arith.constant 2 : index
    %c0_99 = arith.constant 0 : index
    %c0_100 = arith.constant 0 : index
    %242 = vector.load %arg6[%c2_98, %c0_99, %c0_100] : memref<4x64x64xbf16, #tpu.memory_space<vmem>>, vector<1x64x64xbf16>
    %243 = vector.shape_cast %242 : vector<1x64x64xbf16> to vector<64x64xbf16>
    %cst_101 = arith.constant dense<0.000000e+00> : vector<1x64xf32>
    %244 = tpu.matmul %241, %243, %cst_101 {dimension_numbers = #tpu.dot_dimension_numbers<[1], [0], [0], [1], [0, 0, 1, 1], [], []>} : vector<1x64xbf16>, vector<64x64xbf16>, vector<1x64xf32> -> vector<1x64xf32>
    %245 = arith.addf %231, %244 : vector<1x64xf32>
    %246 = vector.extract_strided_slice %204 {offsets = [0, 2, 2, 0], sizes = [1, 2, 2, 64], strides = [1, 1, 1, 1]} : vector<1x4x4x64xf32> to vector<1x2x2x64xf32>
    %247 = vector.extract_strided_slice %246 {offsets = [0, 0, 0, 0], sizes = [1, 1, 2, 64], strides = [1, 1, 1, 1]} : vector<1x2x2x64xf32> to vector<1x1x2x64xf32>
    %248 = vector.shape_cast %247 : vector<1x1x2x64xf32> to vector<1x2x64xf32>
    %249 = vector.extract_strided_slice %246 {offsets = [0, 1, 0, 0], sizes = [1, 1, 2, 64], strides = [1, 1, 1, 1]} : vector<1x2x2x64xf32> to vector<1x1x2x64xf32>
    %250 = vector.shape_cast %249 : vector<1x1x2x64xf32> to vector<1x2x64xf32>
    %251 = arith.maximumf %248, %250 : vector<1x2x64xf32>
    %cst_102 = arith.constant dense<0xFF800000> : vector<1x64xf32>
    %252 = vector.multi_reduction <maximumf>, %251, %cst_102 [1] : vector<1x2x64xf32> to vector<1x64xf32>
    %cst_103 = arith.constant 0.000000e+00 : f32
    %253 = vector.broadcast %cst_103 : f32 to vector<1x64xf32>
    %254 = arith.maximumf %252, %253 : vector<1x64xf32>
    %255 = arith.truncf %254 : vector<1x64xf32> to vector<1x64xbf16>
    %c3_104 = arith.constant 3 : index
    %c0_105 = arith.constant 0 : index
    %c0_106 = arith.constant 0 : index
    %256 = vector.load %arg6[%c3_104, %c0_105, %c0_106] : memref<4x64x64xbf16, #tpu.memory_space<vmem>>, vector<1x64x64xbf16>
    %257 = vector.shape_cast %256 : vector<1x64x64xbf16> to vector<64x64xbf16>
    %cst_107 = arith.constant dense<0.000000e+00> : vector<1x64xf32>
    %258 = tpu.matmul %255, %257, %cst_107 {dimension_numbers = #tpu.dot_dimension_numbers<[1], [0], [0], [1], [0, 0, 1, 1], [], []>} : vector<1x64xbf16>, vector<64x64xbf16>, vector<1x64xf32> -> vector<1x64xf32>
    %259 = arith.addf %245, %258 : vector<1x64xf32>
    %c0_108 = arith.constant 0 : index
    %c0_109 = arith.constant 0 : index
    %260 = vector.load %arg7[%c0_108, %c0_109] : memref<1x64xf32, #tpu.memory_space<vmem>>, vector<1x64xf32>
    %261 = arith.addf %259, %260 : vector<1x64xf32>
    %cst_110 = arith.constant 0.000000e+00 : f32
    %262 = vector.broadcast %cst_110 : f32 to vector<1x64xf32>
    %263 = arith.maximumf %261, %262 : vector<1x64xf32>
    %264 = arith.truncf %263 : vector<1x64xf32> to vector<1x64xbf16>
    %c0_111 = arith.constant 0 : index
    %c0_112 = arith.constant 0 : index
    %265 = vector.load %arg8[%c0_111, %c0_112] : memref<64x128xbf16, #tpu.memory_space<vmem>>, vector<64x128xbf16>
    %cst_113 = arith.constant dense<0.000000e+00> : vector<1x128xf32>
    %266 = tpu.matmul %264, %265, %cst_113 {dimension_numbers = #tpu.dot_dimension_numbers<[1], [0], [0], [1], [0, 0, 1, 1], [], []>} : vector<1x64xbf16>, vector<64x128xbf16>, vector<1x128xf32> -> vector<1x128xf32>
    %c0_114 = arith.constant 0 : index
    %c0_115 = arith.constant 0 : index
    %267 = vector.load %arg9[%c0_114, %c0_115] : memref<1x128xf32, #tpu.memory_space<vmem>>, vector<1x128xf32>
    %268 = arith.addf %266, %267 : vector<1x128xf32>
    %c0_116 = arith.constant 0 : index
    %c0_117 = arith.constant 0 : index
    %c0_118 = arith.constant 0 : index
    %269 = vector.load %arg10[%c0_116, %c0_117, %c0_118] : memref<1x1x128xf32, #tpu.memory_space<vmem>>, vector<1x1x128xf32>
    %270 = vector.shape_cast %269 : vector<1x1x128xf32> to vector<1x128xf32>
    %271 = vector.shape_cast %268 : vector<1x128xf32> to vector<1x1x128xf32>
    tpu.vector_store %arg10[%c0_116, %c0_117, %c0_118], %271 {strides = array<i32>} : memref<1x1x128xf32, #tpu.memory_space<vmem>>, vector<1x1x128xf32>,
    return
  }
  func.func @transform_0(%arg0: i32) -> (i32, i32) {
    %c0_i32 = arith.constant 0 : i32
    %c0_i32_0 = arith.constant 0 : i32
    return %arg0, %c0_i32 : i32, i32
  }
  func.func @transform_1(%arg0: i32) -> (i32, i32) {
    %c0_i32 = arith.constant 0 : i32
    %c0_i32_0 = arith.constant 0 : i32
    %c0_i32_1 = arith.constant 0 : i32
    return %c0_i32, %c0_i32_0 : i32, i32
  }
  func.func @transform_2(%arg0: i32) -> (i32, i32) {
    %c0_i32 = arith.constant 0 : i32
    %c0_i32_0 = arith.constant 0 : i32
    %c0_i32_1 = arith.constant 0 : i32
    return %c0_i32, %c0_i32_0 : i32, i32
  }
  func.func @transform_3(%arg0: i32) -> (i32, i32, i32) {
    %c0_i32 = arith.constant 0 : i32
    %c0_i32_0 = arith.constant 0 : i32
    %c0_i32_1 = arith.constant 0 : i32
    %c0_i32_2 = arith.constant 0 : i32
    return %c0_i32, %c0_i32_0, %c0_i32_1 : i32, i32, i32
  }
  func.func @transform_4(%arg0: i32) -> (i32, i32) {
    %c0_i32 = arith.constant 0 : i32
    %c0_i32_0 = arith.constant 0 : i32
    %c0_i32_1 = arith.constant 0 : i32
    return %c0_i32, %c0_i32_0 : i32, i32
  }
  func.func @transform_5(%arg0: i32) -> (i32, i32, i32) {
    %c0_i32 = arith.constant 0 : i32
    %c0_i32_0 = arith.constant 0 : i32
    %c0_i32_1 = arith.constant 0 : i32
    %c0_i32_2 = arith.constant 0 : i32
    return %c0_i32, %c0_i32_0, %c0_i32_1 : i32, i32, i32
  }
  func.func @transform_6(%arg0: i32) -> (i32, i32) {
    %c0_i32 = arith.constant 0 : i32
    %c0_i32_0 = arith.constant 0 : i32
    %c0_i32_1 = arith.constant 0 : i32
    return %c0_i32, %c0_i32_0 : i32, i32
  }
  func.func @transform_7(%arg0: i32) -> (i32, i32) {
    %c0_i32 = arith.constant 0 : i32
    %c0_i32_0 = arith.constant 0 : i32
    %c0_i32_1 = arith.constant 0 : i32
    return %c0_i32, %c0_i32_0 : i32, i32
  }
  func.func @transform_8(%arg0: i32) -> (i32, i32) {
    %c0_i32 = arith.constant 0 : i32
    %c0_i32_0 = arith.constant 0 : i32
    %c0_i32_1 = arith.constant 0 : i32
    return %c0_i32, %c0_i32_0 : i32, i32
  }
  func.func @transform_9(%arg0: i32) -> (i32, i32, i32) {
    %c0_i32 = arith.constant 0 : i32
    %c0_i32_0 = arith.constant 0 : i32
    %c0_i32_1 = arith.constant 0 : i32
    return %arg0, %c0_i32, %c0_i32_0 : i32, i32, i32
  }
}

</mosaic_0001>

<bundles_post_ra>
// kernel: net_forward.1
= control target key start
LH: loop header
LB: loop body
LE: loop exit
PB: predicated region body
PF: predicated region fallthrough
CT: control target
= control target key end

     0   :  { %14 = vsyncpa [#allocation3], 0  ;;  %s5346_s0 = inlined_call_operand.vmem [shape: bf16[1152,25], index: 0, kind: input, shape index: {}]   ;;  %s5347_s1 = inlined_call_operand.vmem [shape: bf16[25,32], index: 1, kind: input, shape index: {}]   ;;  %s5348_s2 = inlined_call_operand.vmem [shape: f32[1,32], index: 2, kind: input, shape index: {}]   ;;  %s5349_s3 = inlined_call_operand.vmem [shape: bf16[25,32,64], index: 3, kind: input, shape index: {}]   ;;  %s5350_s4 = inlined_call_operand.vmem [shape: f32[1,64], index: 4, kind: input, shape index: {}]   ;;  %s5351_s5 = inlined_call_operand.vmem [shape: bf16[4,64,64], index: 5, kind: input, shape index: {}]   ;;  %s5352_s6 = inlined_call_operand.vmem [shape: f32[1,64], index: 6, kind: input, shape index: {}]   ;;  %s5353_s7 = inlined_call_operand.vmem [shape: bf16[64,128], index: 7, kind: input, shape index: {}]   ;;  %s5354_s8 = inlined_call_operand.vmem [shape: f32[1,128], index: 8, kind: input, shape index: {}]   ;;  %s5355_s9 = inlined_call_operand.hbm [shape: f32[2,1,128], index: 9, kind: output, shape index: {}]  }
   0x1   :  { %16 = vsyncpa [#allocation3 + $0x1], 0  ;;  %s4738_s30 = smov 0   ;;  %s4740_s10 = smov 0  }
   0x2   :  { %s4742_s11 = smov 0   ;;  %s4744_s12 = smov 0  }
   0x3 LB: > { %s4759_s13 = sadd.s32 4294967295, %s4682_s12   ;;  %s3644_s14 = sadd.s32 4294967294, %s4682_s12   ;;  %s4682_s12 = sphi %s4744_s12, %s5361_s12   ;;  %s4678_s11 = sphi %s4742_s11, %s5360_s11   ;;  %s4674_s10 = sphi %s4740_s10, %s5359_s10   ;;  %s4670_s30 = sphi %s4738_s30, %s5358_s30  }
   0x4   : > { %s4763_s15 = sadd.s32 1, %s4682_s12   ;;  %s223_s16 = sadd.s32 1, %s4678_s11 }
   0x5   : > { %s220_s17 = ssub.s32 %s4682_s12, %s4763_s15  ;;  %p233_p0 = scmp.ne.s32.totalorder %s4678_s11, %s4674_s10 }
   0x6   : > { %p221_p1 = scmp.eq.s32.totalorder %s220_s17, 0  ;;  %p234_p2 = scmp.eq.s32.totalorder %s4759_s13, 1 }
   0x7   : > { %p239_p3 = scmp.ne.s32.totalorder %s4674_s10, %s4670_s30  ;;  %p240_p4 = scmp.eq.s32.totalorder %s3644_s14, 1 }
   0x8   : > { %s4774_s18 = scalar_select %p221_p1, %s4678_s11, %s223_s16  }
   0x9   : > { %p4776_p5 = por %p234_p2, %p233_p0  ;;  %p4780_p6 = por %p240_p4, %p239_p3 }
   0xa   : > { %p3647_p7 = scmp.ge.s32.totalorder %s4682_s12, 1  ;;  %p291_p8 = scmp.lt.s32.totalorder %s4682_s12, 3 }
   0xc   : > { %p292_p9 = pnand %p3647_p7, %p291_p8 }
   0xd   : > { %s326_s23 = smul.u32 (!%p292_p9), 72, %s4759_s13  ;;  %s324_s17 = sand.u32 (!%p292_p9), 1, %s4674_s10  }
   0xe   : > { %295 = sbr.rel (%p292_p9) target bundleno = 1182 (0x49e), region = 56  ;;  %s325_s24 = scalar_lea.vmem (!%p292_p9), [#allocation2], %s324_s17 }
   0xf   : > { %p327_p10 = scmp.lt.s32.totalorder (!%p292_p9), %s326_s23, 143  ;;  %s3589_s25 = sshll.u32 (!%p292_p9), %s325_s24, 4  ;;  %s5307_s25 = int_to_ptr.vmem [resolvable:$true] %s3589_s25 }
  0x10   : > { %s4622_s14 = scalar_lea.vmem (!%p292_p9), %s5307_s25, 16 }
  0x11   : > { %p4623_p11 = scmp.ne.s32.totalorder (!%p292_p9), %s5307_s25, %s4622_s14 }
  0x13   : > { %v4514_v0 = vld [vmem:[%s5347_s1 + $0x8] sm:$0x1f]   ;;  %vm709_vm0 = vcmask 1043456   ;;  %vm710_vm1 = vcmask 1044480   ;;  %v4684_v1 = vmov 65535   ;;  %v4515_v5 = vld [vmem:[%s5347_s1] sm:$0xff]   ;;  %p4624_p12 = pnand %p4623_p11, %p4776_p5 }
  0x14   : > { %v711_v2 = vsel %vm709_vm0, 4294967295, %v4684_v1  ;;  %s5363_s23 = smov (!%p327_p10, %s326_s23), 143  ;;  %vm600_vm2 = vcmask 203776   ;;  %v4552_v46 = vld [vmem:[%s5349_s3 + $0x8] sm:$0xff]   ;;  %v4554_v49 = vld [vmem:[%s5349_s3] sm:$0xff]   ;;  %v4882_v53 = vld [vmem:[%s5349_s3 + $0x18] sm:$0xff]  }
  0x15   : > { %v712_v3 = vsel %vm710_vm1, %v711_v2, 0  ;;  %s3648_s26 = sshll.u32 %s5363_s23, 2  ;;  %4212 = vmatprep.subr.bf16.mxu1 %v4552_v46  ;;  %v4553_v51 = vld [vmem:[%s5349_s3 + $0x128] sm:$0xff]   ;;  %v4557_v57 = vld [vmem:[%s5349_s3 + $0x120] sm:$0xff]   ;;  %vm1142_vm3 = vcmask 261120   ;;  %vm4686_vm4 = vmmov 0   ;;  %p4625_p13 = pneg %p4624_p12 }
  0x16   : > { %v714_v4 = vand.u32 %v4514_v0, %v712_v3  ;;  %s4796_s29 = scalar_lea.vmem %s5346_s0, %s3648_s26  ;;  %4213 = vmatpush3.bf16.msra.mxu1 %v4552_v46  ;;  %v4891_v62 = vld [vmem:[%s5349_s3 + $0x148] sm:$0xff]   ;;  %vm3150_vm5 = vcmask 517120   ;;  %vm3168_vm6 = vcmask 519170   ;;  %vm3211_vm7 = vcmask 523264   ;;  %s3970_s23 = sshll.u32 %s4759_s13, 4 }
  0x17   : > { %v4516_v6 = vld [vmem:[%s4796_s29] sm:$0xff]   ;;  %v4517_v7 = vld [vmem:[%s4796_s29 + $0x8] sm:$0xff]   ;;  %v4518_v8 = vld [vmem:[%s4796_s29 + $0x10] sm:$0xff]   ;;  %4214 = vmatprep.subr.bf16.mxu1 %v4554_v49  ;;  %s5305_s28 = scalar_lea.hbm %s5355_s9, %s3970_s23  ;;  %s4687_s13 = smov [#allocation2]  }
  0x18   : > { %4136 = vmatprep.subr.bf16.mxu0 %v714_v4  ;;  %4140 = vmatprep.mubr.msk.bf16.mxu0 %vm600_vm2, %v4516_v6  ;;  %v4519_v9 = vld [vmem:[%s4796_s29 + $0x18] sm:$0xff]   ;;  %v4520_v10 = vld [vmem:[%s4796_s29 + $0x20] sm:$0xff]   ;;  %v4521_v11 = vld [vmem:[%s4796_s29 + $0x28] sm:$0xff]   ;;  %s4626_s16 = sshll.u32 %s4687_s13, 4  ;;  %s4627_s16 = int_to_ptr.vmem [resolvable:$false] %s4626_s16 }
  0x19   : > { %4137 = vmatpush3.bf16.msra.mxu0 %v714_v4  ;;  %v4522_v12 = vld [vmem:[%s4796_s29 + $0x30] sm:$0xff]   ;;  %v4523_v13 = vld [vmem:[%s4796_s29 + $0x38] sm:$0xff]   ;;  %v4524_v14 = vld [vmem:[%s4796_s29 + $0x40] sm:$0xff]   ;;  %s4628_s21 = scalar_lea.vmem %s4627_s16, 32  ;;  %p4629_p0 = scmp.lt.s32.totalorder %s5307_s25, %s4627_s16 }
  0x1a   : > { %4138 = vmatprep.subr.bf16.mxu0 %v4515_v5  ;;  %v4525_v15 = vld [vmem:[%s4796_s29 + $0x48] sm:$0xff]   ;;  %v4526_v16 = vld [vmem:[%s4796_s29 + $0x50] sm:$0xff]   ;;  %v4527_v17 = vld [vmem:[%s4796_s29 + $0x58] sm:$0xff]   ;;  %4215 = vmatpush3.bf16.msra.mxu1 %v4554_v49  ;;  %p4630_p1 = scmp.lt.s32.totalorder %s4628_s21, %s4622_s14 }
  0x1b   : > { %v4528_v18 = vld [vmem:[%s4796_s29 + $0x60] sm:$0xff]   ;;  %v4529_v19 = vld [vmem:[%s4796_s29 + $0x68] sm:$0xff]   ;;  %v4530_v20 = vld [vmem:[%s4796_s29 + $0x70] sm:$0xff]   ;;  %4220 = vmatprep.subr.bf16.mxu1 %v4882_v53 }
  0x1c   : > { %v4531_v21 = vld [vmem:[%s4796_s29 + $0x78] sm:$0xff]   ;;  %v4532_v22 = vld [vmem:[%s4796_s29 + $0x80] sm:$0xff]   ;;  %v4533_v23 = vld [vmem:[%s4796_s29 + $0x88] sm:$0xff]   ;;  %p4631_p2 = por %p4630_p1, %p4629_p0 }
  0x1d   : > { %4139 = vmatpush3.bf16.msra.mxu0 %v4515_v5  ;;  %v4534_v24 = vld [vmem:[%s4796_s29 + $0x90] sm:$0xff]   ;;  %v4535_v25 = vld [vmem:[%s4796_s29 + $0x98] sm:$0xff]   ;;  %v4536_v26 = vld [vmem:[%s4796_s29 + $0xa0] sm:$0xff]  }
  0x1e   : > { %v4537_v27 = vld [vmem:[%s4796_s29 + $0xa8] sm:$0xff]   ;;  %v4538_v28 = vld [vmem:[%s4796_s29 + $0xb0] sm:$0xff]   ;;  %v4539_v29 = vld [vmem:[%s4796_s29 + $0xb8] sm:$0xff]   ;;  %4356 = vmatprep.subr.bf16.mxu0 %v4553_v51  ;;  %p4632_p3 = pnand %p4631_p2, %p4625_p13 }
  0x1f   : > { %v4540_v30 = vld [vmem:[%s4796_s29 + $0xc0] sm:$0xff]   ;;  %v4541_v31 = vld [vmem:[%s4796_s29 + $0xc8] sm:$0xff]   ;;  %v4542_v32 = vld [vmem:[%s4796_s29 + $0xd0] sm:$0xff]  }
  0x20   : > { %4141 = vmatmul.mubr.msk.bf16.vlgmr.msra.gmra.mxu0 %vm600_vm2, %v4517_v7  ;;  %v4543_v33 = vld [vmem:[%s4796_s29 + $0xd8] sm:$0xff]   ;;  %v4544_v34 = vld [vmem:[%s4796_s29 + $0xe0] sm:$0xff]   ;;  %v4545_v35 = vld [vmem:[%s4796_s29 + $0xe8] sm:$0xff]  }
  0x21   : > { %4144 = vmatprep.mubr.msk.bf16.mxu0 %vm600_vm2, %v4518_v8  ;;  %v4546_v36 = vld [vmem:[%s4796_s29 + $0xf0] sm:$0xff]   ;;  %v4547_v37 = vld [vmem:[%s4796_s29 + $0xf8] sm:$0xff]   ;;  %v4548_v38 = vld [vmem:[%s4796_s29 + $0x100] sm:$0xff]   ;;  %4357 = vmatpush3.bf16.msra.mxu0 %v4553_v51 }
  0x22   : > { %v4549_v39 = vld [vmem:[%s4796_s29 + $0x108] sm:$0xff]   ;;  %v4550_v40 = vld [vmem:[%s4796_s29 + $0x110] sm:$0xff]   ;;  %v4551_v41 = vld [vmem:[%s4796_s29 + $0x118] sm:$0xff]   ;;  %4358 = vmatprep.subr.bf16.mxu0 %v4557_v57  ;;  %s3577_s29 = scalar_lea.sflag [#allocation3], %s324_s17 }
  0x25   : > { %4359 = vmatpush3.bf16.msra.mxu0 %v4557_v57 }
  0x26   : > { %4372 = vmatprep.subr.bf16.mxu0 %v4891_v62 }
  0x28   : > { %4145 = vmatmul.mubr.msk.bf16.gmra.mxu0 %vm600_vm2, %v4519_v9 }
  0x29   : > { %4148 = vmatprep.mubr.msk.bf16.mxu0 %vm600_vm2, %v4520_v10 }
  0x30   : > { %4149 = vmatmul.mubr.msk.bf16.gmra.mxu0 %vm600_vm2, %v4521_v11 }
  0x31   : > { %4152 = vmatprep.mubr.msk.bf16.mxu0 %vm600_vm2, %v4522_v12 }
  0x38   : > { %4153 = vmatmul.mubr.msk.bf16.gmra.mxu0 %vm600_vm2, %v4523_v13 }
  0x39   : > { %4156 = vmatprep.mubr.msk.bf16.mxu0 %vm600_vm2, %v4524_v14 }
  0x40   : > { %4157 = vmatmul.mubr.msk.bf16.gmra.mxu0 %vm600_vm2, %v4525_v15 }
  0x41   : > { %4160 = vmatprep.mubr.msk.bf16.mxu0 %vm600_vm2, %v4526_v16 }
  0x48   : > { %4161 = vmatmul.mubr.msk.bf16.gmra.mxu0 %vm600_vm2, %v4527_v17 }
  0x49   : > { %4164 = vmatprep.mubr.msk.bf16.mxu0 %vm600_vm2, %v4528_v18 }
  0x50   : > { %4165 = vmatmul.mubr.msk.bf16.gmra.mxu0 %vm600_vm2, %v4529_v19 }
  0x51   : > { %4168 = vmatprep.mubr.msk.bf16.mxu0 %vm600_vm2, %v4530_v20 }
  0x58   : > { %4169 = vmatmul.mubr.msk.bf16.gmra.mxu0 %vm600_vm2, %v4531_v21 }
  0x59   : > { %4172 = vmatprep.mubr.msk.bf16.mxu0 %vm600_vm2, %v4532_v22 }
  0x60   : > { %4173 = vmatmul.mubr.msk.bf16.gmra.mxu0 %vm600_vm2, %v4533_v23 }
  0x61   : > { %4176 = vmatprep.mubr.msk.bf16.mxu0 %vm600_vm2, %v4534_v24 }
  0x68   : > { %4177 = vmatmul.mubr.msk.bf16.gmra.mxu0 %vm600_vm2, %v4535_v25 }
  0x69   : > { %4180 = vmatprep.mubr.msk.bf16.mxu0 %vm600_vm2, %v4536_v26 }
  0x70   : > { %4181 = vmatmul.mubr.msk.bf16.gmra.mxu0 %vm600_vm2, %v4537_v27 }
  0x71   : > { %4184 = vmatprep.mubr.msk.bf16.mxu0 %vm600_vm2, %v4538_v28 }
  0x78   : > { %4185 = vmatmul.mubr.msk.bf16.gmra.mxu0 %vm600_vm2, %v4539_v29 }
  0x79   : > { %4188 = vmatprep.mubr.msk.bf16.mxu0 %vm600_vm2, %v4540_v30 }
  0x80   : > { %4189 = vmatmul.mubr.msk.bf16.gmra.mxu0 %vm600_vm2, %v4541_v31 }
  0x81   : > { %4192 = vmatprep.mubr.msk.bf16.mxu0 %vm600_vm2, %v4542_v32 }
  0x88   : > { %4193 = vmatmul.mubr.msk.bf16.gmra.mxu0 %vm600_vm2, %v4543_v33 }
  0x89   : > { %4196 = vmatprep.mubr.msk.bf16.mxu0 %vm600_vm2, %v4544_v34 }
  0x90   : > { %4197 = vmatmul.mubr.msk.bf16.gmra.mxu0 %vm600_vm2, %v4545_v35 }
  0x91   : > { %4200 = vmatprep.mubr.msk.bf16.mxu0 %vm600_vm2, %v4546_v36 }
  0x98   : > { %4201 = vmatmul.mubr.msk.bf16.gmra.mxu0 %vm600_vm2, %v4547_v37 }
  0x99   : > { %4204 = vmatprep.mubr.msk.bf16.mxu0 %vm600_vm2, %v4548_v38 }
  0xa0   : > { %4205 = vmatmul.mubr.msk.bf16.gmra.mxu0 %vm600_vm2, %v4549_v39 }
  0xa1   : > { %4208 = vmatprep.mubr.msk.bf16.mxu0 %vm600_vm2, %v4550_v40 }
  0xa8   : > { %4209 = vmatmul.mubr.msk.bf16.gmra.mxu0 %vm600_vm2, %v4551_v41 }
  0xe0   : > { %v4142_v42 = vpop.f32.mrf.mxu0 }
  0xe2   : > { %v750_v43 = vpop.f32.mrf.mxu0 }
  0xe4   : > { %v4143_v44 = vpop.f32.mrf.mxu0 }
  0xe6   : > { %v753_v45 = vpop.f32.mrf.mxu0 }
  0xe8   : > { %v4146_v47 = vpop.f32.mrf.mxu0 }
  0xea   : > { %v766_v48 = vpop.f32.mrf.mxu0 }
  0xec   : > { %v4147_v50 = vpop.f32.mrf.mxu0 }
  0xee   : > { %v769_v52 = vpop.f32.mrf.mxu0 }
  0xf0   : > { %v4150_v54 = vpop.f32.mrf.mxu0 }
  0xf1   : > { %v1039_v55 = vmax.f32 %v4142_v42, %v4150_v54 }
  0xf2   : > { %v782_v56 = vpop.f32.mrf.mxu0 }
  0xf3   : > { %v1037_v58 = vmax.f32 %v750_v43, %v782_v56 }
  0xf4   : > { %v4151_v59 = vpop.f32.mrf.mxu0 }
  0xf5   : > { %v1040_v60 = vmax.f32 %v4143_v44, %v4151_v59 }
  0xf6   : > { %v785_v61 = vpop.f32.mrf.mxu0 }
  0xf7   : > { %v1038_v63 = vmax.f32 %v753_v45, %v785_v61 }
  0xf8   : > { %v4154_v0 = vpop.f32.mrf.mxu0 }
  0xf9   : > { %v1043_v1 = vmax.f32 %v4146_v47, %v4154_v0 }
  0xfa   : > { %v798_v2 = vpop.f32.mrf.mxu0 }
  0xfb   : > { %v1041_v3 = vmax.f32 %v766_v48, %v798_v2 }
  0xfc   : > { %v4155_v4 = vpop.f32.mrf.mxu0 }
  0xfd   : > { %v1044_v5 = vmax.f32 %v4147_v50, %v4155_v4 }
  0xfe   : > { %v801_v6 = vpop.f32.mrf.mxu0 }
  0xff   : > { %v1042_v7 = vmax.f32 %v769_v52, %v801_v6 }
 0x100   : > { %v4158_v8 = vpop.f32.mrf.mxu0 }
 0x101   : > { %v1047_v9 = vmax.f32 %v1039_v55, %v4158_v8 }
 0x102   : > { %v814_v10 = vpop.f32.mrf.mxu0 }
 0x103   : > { %v1045_v11 = vmax.f32 %v1037_v58, %v814_v10 }
 0x104   : > { %v4159_v12 = vpop.f32.mrf.mxu0 }
 0x105   : > { %v4894_v13 = vmax.f32 %v1040_v60, %v4159_v12 }
 0x106   : > { %v817_v14 = vpop.f32.mrf.mxu0 }
 0x107   : > { %v4896_v15 = vmax.f32 %v1038_v63, %v817_v14 }
 0x108   : > { %v4162_v16 = vpop.f32.mrf.mxu0 }
 0x109   : > { %v4898_v17 = vmax.f32 %v1043_v1, %v4162_v16 }
 0x10a   : > { %v830_v18 = vpop.f32.mrf.mxu0 }
 0x10b   : > { %v4900_v19 = vmax.f32 %v1041_v3, %v830_v18 }
 0x10c   : > { %v4163_v20 = vpop.f32.mrf.mxu0 }
 0x10d   : > { %v1052_v21 = vmax.f32 %v1044_v5, %v4163_v20 }
 0x10e   : > { %v833_v22 = vpop.f32.mrf.mxu0 }
 0x10f   : > { %v4902_v23 = vmax.f32 %v1042_v7, %v833_v22 }
 0x110   : > { %v4166_v24 = vpop.f32.mrf.mxu0 }
 0x111   : > { %v1055_v25 = vmax.f32 %v1047_v9, %v4166_v24 }
 0x112   : > { %v846_v26 = vpop.f32.mrf.mxu0 }
 0x113   : > { %v1053_v27 = vmax.f32 %v1045_v11, %v846_v26 }
 0x114   : > { %v4167_v28 = vpop.f32.mrf.mxu0 }
 0x115   : > { %v1056_v29 = vmax.f32 %v4894_v13, %v4167_v28 }
 0x116   : > { %v849_v30 = vpop.f32.mrf.mxu0 }
 0x117   : > { %v1054_v31 = vmax.f32 %v4896_v15, %v849_v30 }
 0x118   : > { %v4170_v32 = vpop.f32.mrf.mxu0 }
 0x119   : > { %v1059_v33 = vmax.f32 %v4898_v17, %v4170_v32 }
 0x11a   : > { %v862_v34 = vpop.f32.mrf.mxu0 }
 0x11b   : > { %v1057_v35 = vmax.f32 %v4900_v19, %v862_v34 }
 0x11c   : > { %v4171_v36 = vpop.f32.mrf.mxu0 }
 0x11d   : > { %v1060_v37 = vmax.f32 %v1052_v21, %v4171_v36 }
 0x11e   : > { %v4908_v38 = vpop.f32.mrf.mxu0 }
 0x11f   : > { %v1058_v39 = vmax.f32 %v4902_v23, %v4908_v38 }
 0x120   : > { %v4174_v40 = vpop.f32.mrf.mxu0 }
 0x121   : > { %v1063_v8 = vmax.f32 %v1055_v25, %v4174_v40  ;;  %v3723_v25 = vld [vmem:[%s5348_s2] ss:$0 sm:$0xff] }
 0x122   : > { %v878_v41 = vpop.f32.mrf.mxu0 }
 0x123   : > { %v1061_v10 = vmax.f32 %v1053_v27, %v878_v41 }
 0x124   : > { %v4175_v42 = vpop.f32.mrf.mxu0 }
 0x125   : > { %v1064_v13 = vmax.f32 %v1056_v29, %v4175_v42 }
 0x126   : > { %v881_v43 = vpop.f32.mrf.mxu0 }
 0x127   : > { %v1062_v17 = vmax.f32 %v1054_v31, %v881_v43 }
 0x128   : > { %v4178_v44 = vpop.f32.mrf.mxu0 }
 0x129   : > { %v1067_v28 = vmax.f32 %v1059_v33, %v4178_v44 }
 0x12a   : > { %v894_v45 = vpop.f32.mrf.mxu0 }
 0x12b   : > { %v1065_v30 = vmax.f32 %v1057_v35, %v894_v45 }
 0x12c   : > { %v4179_v46 = vpop.f32.mrf.mxu0 }
 0x12d   : > { %v4912_v47 = vmax.f32 %v1060_v37, %v4179_v46 }
 0x12e   : > { %v897_v48 = vpop.f32.mrf.mxu0 }
 0x12f   : > { %v1066_v42 = vmax.f32 %v1058_v39, %v897_v48 }
 0x130   : > { %v4182_v49 = vpop.f32.mrf.mxu0 }
 0x131   : > { %v1071_v11 = vmax.f32 %v1063_v8, %v4182_v49 }
 0x132   : > { %v910_v50 = vpop.f32.mrf.mxu0 }
 0x133   : > { %v1069_v14 = vmax.f32 %v1061_v10, %v910_v50 }
 0x134   : > { %v4183_v51 = vpop.f32.mrf.mxu0 }
 0x135   : > { %v1072_v18 = vmax.f32 %v1064_v13, %v4183_v51 }
 0x136   : > { %v913_v52 = vpop.f32.mrf.mxu0 }
 0x137   : > { %v1070_v22 = vmax.f32 %v1062_v17, %v913_v52  ;;  %v4558_v17 = vld [vmem:[%s5349_s3 + $0x28] sm:$0xff]  }
 0x138   : > { %v4186_v54 = vpop.f32.mrf.mxu0 }
 0x139   : > { %v1075_v36 = vmax.f32 %v1067_v28, %v4186_v54  ;;  %v4567_v28 = vld [vmem:[%s5349_s3 + $0x188] sm:$0xff]  }
 0x13a   : > { %v926_v55 = vpop.f32.mrf.mxu0 }
 0x13b   : > { %v1073_v37 = vmax.f32 %v1065_v30, %v926_v55  ;;  %v4569_v30 = vld [vmem:[%s5349_s3 + $0x180] sm:$0xff]  }
 0x13c   : > { %v4187_v56 = vpop.f32.mrf.mxu0 }
 0x13d   : > { %v1076_v51 = vmax.f32 %v4912_v47, %v4187_v56 }
 0x13e   : > { %v929_v57 = vpop.f32.mrf.mxu0 }
 0x13f   : > { %v1074_v52 = vmax.f32 %v1066_v42, %v929_v57  ;;  %v4579_v42 = vld [vmem:[%s5349_s3 + $0x90] sm:$0xff]  }
 0x140   : > { %v4190_v58 = vpop.f32.mrf.mxu0 }
 0x141   : > { %v1079_v15 = vmax.f32 %v1071_v11, %v4190_v58 }
 0x142   : > { %v942_v59 = vpop.f32.mrf.mxu0 }
 0x143   : > { %v1077_v19 = vmax.f32 %v1069_v14, %v942_v59 }
 0x144   : > { %v4191_v60 = vpop.f32.mrf.mxu0 }
 0x145   : > { %v1080_v23 = vmax.f32 %v1072_v18, %v4191_v60 }
 0x146   : > { %v945_v61 = vpop.f32.mrf.mxu0 }
 0x147   : > { %v1078_v29 = vmax.f32 %v1070_v22, %v945_v61  ;;  %v4561_v22 = vld [vmem:[%s5349_s3 + $0x140] sm:$0xff]  }
 0x148   : > { %v4194_v63 = vpop.f32.mrf.mxu0 }
 0x149   : > { %v1083_v43 = vmax.f32 %v1075_v36, %v4194_v63  ;;  %v4573_v36 = vld [vmem:[%s5349_s3 + $0x60] sm:$0xff]  }
 0x14a   : > { %v958_v0 = vpop.f32.mrf.mxu0 }
 0x14b   : > { %v1081_v49 = vmax.f32 %v1073_v37, %v958_v0  ;;  %v4575_v37 = vld [vmem:[%s5349_s3 + $0x70] sm:$0xff]  }
 0x14c   : > { %v4195_v1 = vpop.f32.mrf.mxu0 }
 0x14d   : > { %v1084_v55 = vmax.f32 %v1076_v51, %v4195_v1  ;;  %v4586_v51 = vld [vmem:[%s5349_s3 + $0xd8] sm:$0xff]  }
 0x14e   : > { %v961_v2 = vpop.f32.mrf.mxu0 }
 0x14f   : > { %v1082_v61 = vmax.f32 %v1074_v52, %v961_v2  ;;  %v4556_v2 = vld [vmem:[%s5349_s3 + $0x10] sm:$0xff]  }
 0x150   : > { %v4198_v3 = vpop.f32.mrf.mxu0  ;;  %v4587_v52 = vld [vmem:[%s5349_s3 + $0xd0] sm:$0xff]  }
 0x151   : > { %v1087_v20 = vmax.f32 %v1079_v15, %v4198_v3 }
 0x152   : > { %v974_v4 = vpop.f32.mrf.mxu0 }
 0x153   : > { %v1085_v24 = vmax.f32 %v1077_v19, %v974_v4 }
 0x154   : > { %v4199_v5 = vpop.f32.mrf.mxu0 }
 0x155   : > { %v1088_v32 = vmax.f32 %v1080_v23, %v4199_v5  ;;  %v4563_v23 = vld [vmem:[%s5349_s3 + $0x168] sm:$0xff]  }
 0x156   : > { %v977_v6 = vpop.f32.mrf.mxu0 }
 0x157   : > { %v1086_v38 = vmax.f32 %v1078_v29, %v977_v6  ;;  %v4570_v29 = vld [vmem:[%s5349_s3 + $0x58] sm:$0xff]  }
 0x158   : > { %v4202_v7 = vpop.f32.mrf.mxu0 }
 0x159   : > { %v1091_v35 = vmax.f32 %v1083_v43, %v4202_v7  ;;  %v4580_v43 = vld [vmem:[%s5349_s3 + $0xa8] sm:$0xff]  }
 0x15a   : > { %v990_v9 = vpop.f32.mrf.mxu0 }
 0x15b   : > { %v1089_v58 = vmax.f32 %v1081_v49, %v990_v9  ;;  %v4582_v49 = vld [vmem:[%s5349_s3 + $0xb8] sm:$0xff]  }
 0x15c   : > { %v4203_v12 = vpop.f32.mrf.mxu0 }
 0x15d   : > { %v1092_v5 = vmax.f32 %v1084_v55, %v4203_v12  ;;  %v4594_v55 = vld [vmem:[%s5349_s3 + $0x118] sm:$0xff]  }
 0x15e   : > { %v993_v16 = vpop.f32.mrf.mxu0 }
 0x15f   : > { %v1090_v47 = vmax.f32 %v1082_v61, %v993_v16  ;;  %v4595_v61 = vld [vmem:[%s5349_s3 + $0x110] sm:$0xff]  }
 0x160   : > { %v4206_v21 = vpop.f32.mrf.mxu0 }
 0x161   : > { %v1095_v26 = vmax.f32 %v1087_v20, %v4206_v21 }
 0x162   : > { %v1006_v27 = vpop.f32.mrf.mxu0 }
 0x163   : > { %v1093_v34 = vmax.f32 %v1085_v24, %v1006_v27  ;;  %v1110_v40 = vadd.f32 %v3723_v25, %v1095_v26  ;;  %v4562_v24 = vld [vmem:[%s5349_s3 + $0x38] sm:$0xff]   ;;  %v4565_v26 = vld [vmem:[%s5349_s3 + $0x160] sm:$0xff]  }
 0x164   : > { %v4207_v31 = vpop.f32.mrf.mxu0  ;;  %v4568_v27 = vld [vmem:[%s5349_s3 + $0x40] sm:$0xff]  }
 0x165   : > { %v1096_v41 = vmax.f32 %v1088_v32, %v4207_v31  ;;  %v1108_v33 = vadd.f32 %v3723_v25, %v1093_v34  ;;  %v1118_v59 = vmax.f32 %v1110_v40, 0.0  ;;  %v4571_v32 = vld [vmem:[%s5349_s3 + $0x50] sm:$0xff]   ;;  %v4572_v34 = vld [vmem:[%s5349_s3 + $0x68] sm:$0xff]   ;;  %v4574_v31 = vld [vmem:[%s5349_s3 + $0x78] sm:$0xff]  }
 0x166   : > { %v1009_v46 = vpop.f32.mrf.mxu0  ;;  %v4577_v40 = vld [vmem:[%s5349_s3 + $0x80] sm:$0xff]  }
 0x167   : > { %v1111_v44 = vadd.f32 %v3723_v25, %v1096_v41  ;;  %v1094_v50 = vmax.f32 %v1086_v38, %v1009_v46  ;;  %v1116_v39 = vmax.f32 %v1108_v33, 0.0  ;;  %v4576_v38 = vld [vmem:[%s5349_s3 + $0x88] sm:$0xff]   ;;  %v4578_v41 = vld [vmem:[%s5349_s3 + $0x98] sm:$0xff]   ;;  %v4581_v46 = vld [vmem:[%s5349_s3 + $0xa0] sm:$0xff]  }
 0x168   : > { %v4210_v45 = vpop.f32.mrf.mxu0  ;;  %v4583_v33 = vld [vmem:[%s5349_s3 + $0xb0] sm:$0xff]  }
 0x169   : > { %v1119_v54 = vmax.f32 %v1111_v44, 0.0  ;;  %v1109_v60 = vadd.f32 %v3723_v25, %v1094_v50  ;;  %v1099_v3 = vmax.f32 %v1091_v35, %v4210_v45  ;;  %v4584_v44 = vld [vmem:[%s5349_s3 + $0xc8] sm:$0xff]   ;;  %v4585_v50 = vld [vmem:[%s5349_s3 + $0xc0] sm:$0xff]  }
 0x16a   : > { %v1022_v4 = vpop.f32.mrf.mxu0  ;;  %v4588_v35 = vld [vmem:[%s5349_s3 + $0xe8] sm:$0xff]   ;;  %v4589_v45 = vld [vmem:[%s5349_s3 + $0xe0] sm:$0xff]  }
 0x16b   : > { %v4918_v48 = vpack.c.bf16 %v1119_v54, %v1118_v59  ;;  %v1117_v63 = vmax.f32 %v1109_v60, 0.0  ;;  %v1097_v0 = vmax.f32 %v1089_v58, %v1022_v4  ;;  %v1114_v8 = vadd.f32 %v3723_v25, %v1099_v3  ;;  %v4590_v58 = vld [vmem:[%s5349_s3 + $0xf8] sm:$0xff]   ;;  %v4593_v60 = vld [vmem:[%s5349_s3 + $0x100] sm:$0xff]   ;;  %v4597_v4 = vld [vmem:[%s5349_s3 + $0x130] sm:$0xff]  }
 0x16c   : > { %v4211_v6 = vpop.f32.mrf.mxu0  ;;  %v4596_v3 = vld [vmem:[%s5349_s3 + $0x138] sm:$0xff]  }
 0x16d   : > { %v4920_v56 = vpack.c.bf16 %v1117_v63, %v1116_v39  ;;  %v4922_v57 = vpack.c.bf16 %v1118_v59, %v1117_v63  ;;  %v1112_v7 = vadd.f32 %v3723_v25, %v1097_v0  ;;  %v1100_v9 = vmax.f32 %v1092_v5, %v4211_v6  ;;  %v4591_v59 = vld [vmem:[%s5349_s3 + $0xf0] sm:$0xff]   ;;  %v4598_v39 = vld [vmem:[%s5349_s3 + $0x158] sm:$0xff]  }
 0x16e   : > { %v1025_v1 = vpop.f32.mrf.mxu0  ;;  %v1122_v15 = vmax.f32 %v1114_v8, 0.0  ;;  %v4600_v63 = vld [vmem:[%s5349_s3 + $0x178] sm:$0xff]   ;;  %v4601_v0 = vld [vmem:[%s5349_s3 + $0x170] sm:$0xff]  }
 0x16f   : > { %v1120_v10 = vmax.f32 %v1112_v7, 0.0  ;;  %v1098_v11 = vmax.f32 %v1090_v47, %v1025_v1  ;;  %4216 = vmatprep.mubr.msk.bf16.mxu1 %vm1142_vm3, %v4920_v56  ;;  %v1115_v12 = vadd.f32 %v3723_v25, %v1100_v9 }
 0x170   : > { %4217 = vmatmul.mubr.msk.bf16.vlgmr.msra.gmra.mxu1 %vm1142_vm3, %v4918_v48 }
 0x171   : > { %v4931_v13 = vpack.c.bf16 %v1120_v10, %v1119_v54  ;;  %v1113_v14 = vadd.f32 %v3723_v25, %v1098_v11  ;;  %4221 = vmatpush3.bf16.msra.mxu1 %v4882_v53  ;;  %4224 = vmatprep.mubr.msk.bf16.mxu1 %vm1142_vm3, %v4920_v56  ;;  %v1123_v16 = vmax.f32 %v1115_v12, 0.0  ;;  %v4560_v53 = vld [vmem:[%s5349_s3 + $0x20] sm:$0xff]   ;;  %v4566_v25 = vld [vmem:[%s5349_s3 + $0x48] sm:$0xff]  }
 0x172   : > { %4222 = vmatprep.subr.bf16.mxu1 %v4556_v2  ;;  %v4592_v54 = vld [vmem:[%s5349_s3 + $0x108] sm:$0xff]  }
 0x173   : > { %v1121_v18 = vmax.f32 %v1113_v14, 0.0  ;;  %4360 = vmatprep.mubr.msk.bf16.mxu0 %vm1142_vm3, %v4931_v13  ;;  %v4941_v19 = vpack.c.bf16 %v1123_v16, %v1122_v15 }
 0x175   : > { %v4943_v20 = vpack.c.bf16 %v1121_v18, %v1120_v10  ;;  %v4945_v21 = vpack.c.bf16 %v1122_v15, %v1121_v18  ;;  %4223 = vmatpush3.bf16.msra.mxu1 %v4556_v2 }
 0x176   : > { %4228 = vmatprep.subr.bf16.mxu1 %v4558_v17 }
 0x177   : > { %4361 = vmatmul.mubr.msk.bf16.vlgmr.msra.gmra.mxu0 %vm1142_vm3, %v4945_v21 }
 0x178   : > { %4225 = vmatmul.mubr.msk.bf16.vlgmr.msra.gmra.mxu1 %vm1142_vm3, %v4918_v48  ;;  %4373 = vmatpush3.bf16.msra.mxu0 %v4891_v62  ;;  %v4564_v62 = vld [vmem:[%s5349_s3 + $0x30] sm:$0xff]  }
 0x179   : > { %4229 = vmatpush3.bf16.msra.mxu1 %v4558_v17  ;;  %4376 = vmatprep.mubr.msk.bf16.mxu0 %vm1142_vm3, %v4943_v20 }
 0x17a   : > { %4232 = vmatprep.mubr.msk.bf16.mxu1 %vm1142_vm3, %v4920_v56  ;;  %4230 = vmatprep.subr.bf16.mxu1 %v4560_v53 }
 0x17b   : > { %4374 = vmatprep.subr.bf16.mxu0 %v4561_v22 }
 0x17c   : > { %4375 = vmatpush3.bf16.msra.mxu0 %v4561_v22 }
 0x17d   : > { %4231 = vmatpush3.bf16.msra.mxu1 %v4560_v53  ;;  %4388 = vmatprep.subr.bf16.mxu0 %v4563_v23 }
 0x17e   : > { %4236 = vmatprep.subr.bf16.mxu1 %v4562_v24 }
 0x17f   : > { %4377 = vmatmul.mubr.msk.bf16.vlgmr.msra.gmra.mxu0 %vm1142_vm3, %v4941_v19 }
 0x180   : > { %4233 = vmatmul.mubr.msk.bf16.vlgmr.msra.gmra.mxu1 %vm1142_vm3, %v4918_v48  ;;  %4389 = vmatpush3.bf16.msra.mxu0 %v4563_v23 }
 0x181   : > { %4237 = vmatpush3.bf16.msra.mxu1 %v4562_v24  ;;  %4392 = vmatprep.mubr.msk.bf16.mxu0 %vm1142_vm3, %v4943_v20 }
 0x182   : > { %4240 = vmatprep.mubr.msk.bf16.mxu1 %vm1142_vm3, %v4920_v56  ;;  %4238 = vmatprep.subr.bf16.mxu1 %v4564_v62 }
 0x183   : > { %4390 = vmatprep.subr.bf16.mxu0 %v4565_v26 }
 0x184   : > { %4391 = vmatpush3.bf16.msra.mxu0 %v4565_v26 }
 0x185   : > { %4239 = vmatpush3.bf16.msra.mxu1 %v4564_v62  ;;  %4404 = vmatprep.subr.bf16.mxu0 %v4567_v28 }
 0x186   : > { %4244 = vmatprep.subr.bf16.mxu1 %v4566_v25 }
 0x187   : > { %4393 = vmatmul.mubr.msk.bf16.vlgmr.msra.gmra.mxu0 %vm1142_vm3, %v4941_v19 }
 0x188   : > { %4241 = vmatmul.mubr.msk.bf16.vlgmr.msra.gmra.mxu1 %vm1142_vm3, %v4918_v48  ;;  %4405 = vmatpush3.bf16.msra.mxu0 %v4567_v28 }
 0x189   : > { %4245 = vmatpush3.bf16.msra.mxu1 %v4566_v25  ;;  %4408 = vmatprep.mubr.msk.bf16.mxu0 %vm1142_vm3, %v4943_v20 }
 0x18a   : > { %4248 = vmatprep.mubr.msk.bf16.mxu1 %vm1142_vm3, %v4920_v56  ;;  %4246 = vmatprep.subr.bf16.mxu1 %v4568_v27 }
 0x18b   : > { %4406 = vmatprep.subr.bf16.mxu0 %v4569_v30 }
 0x18c   : > { %4407 = vmatpush3.bf16.msra.mxu0 %v4569_v30 }
 0x18d   : > { %4247 = vmatpush3.bf16.msra.mxu1 %v4568_v27 }
 0x18e   : > { %4252 = vmatprep.subr.bf16.mxu1 %v4570_v29 }
 0x18f   : > { %4409 = vmatmul.mubr.msk.bf16.vlgmr.msra.gmra.mxu0 %vm1142_vm3, %v4941_v19 }
 0x190   : > { %4249 = vmatmul.mubr.msk.bf16.vlgmr.msra.gmra.mxu1 %vm1142_vm3, %v4918_v48 }
 0x191   : > { %4253 = vmatpush3.bf16.msra.mxu1 %v4570_v29  ;;  %4256 = vmatprep.mubr.msk.bf16.mxu1 %vm1142_vm3, %v4922_v57 }
 0x192   : > { %4254 = vmatprep.subr.bf16.mxu1 %v4571_v32 }
 0x195   : > { %4255 = vmatpush3.bf16.msra.mxu1 %v4571_v32 }
 0x196   : > { %4260 = vmatprep.subr.bf16.mxu1 %v4572_v34 }
 0x198   : > { %4257 = vmatmul.mubr.msk.bf16.vlgmr.msra.gmra.mxu1 %vm1142_vm3, %v4931_v13 }
 0x199   : > { %4261 = vmatpush3.bf16.msra.mxu1 %v4572_v34  ;;  %4264 = vmatprep.mubr.msk.bf16.mxu1 %vm1142_vm3, %v4922_v57 }
 0x19a   : > { %4262 = vmatprep.subr.bf16.mxu1 %v4573_v36 }
 0x19d   : > { %4263 = vmatpush3.bf16.msra.mxu1 %v4573_v36 }
 0x19e   : > { %4268 = vmatprep.subr.bf16.mxu1 %v4574_v31 }
 0x1a0   : > { %4265 = vmatmul.mubr.msk.bf16.vlgmr.msra.gmra.mxu1 %vm1142_vm3, %v4931_v13 }
 0x1a1   : > { %4269 = vmatpush3.bf16.msra.mxu1 %v4574_v31  ;;  %4272 = vmatprep.mubr.msk.bf16.mxu1 %vm1142_vm3, %v4922_v57 }
 0x1a2   : > { %4270 = vmatprep.subr.bf16.mxu1 %v4575_v37 }
 0x1a5   : > { %4271 = vmatpush3.bf16.msra.mxu1 %v4575_v37 }
 0x1a6   : > { %4276 = vmatprep.subr.bf16.mxu1 %v4576_v38 }
 0x1a8   : > { %4273 = vmatmul.mubr.msk.bf16.vlgmr.msra.gmra.mxu1 %vm1142_vm3, %v4931_v13 }
 0x1a9   : > { %4277 = vmatpush3.bf16.msra.mxu1 %v4576_v38  ;;  %4280 = vmatprep.mubr.msk.bf16.mxu1 %vm1142_vm3, %v4922_v57 }
 0x1aa   : > { %4278 = vmatprep.subr.bf16.mxu1 %v4577_v40 }
 0x1ad   : > { %4279 = vmatpush3.bf16.msra.mxu1 %v4577_v40 }
 0x1ae   : > { %4284 = vmatprep.subr.bf16.mxu1 %v4578_v41 }
 0x1b0   : > { %4281 = vmatmul.mubr.msk.bf16.vlgmr.msra.gmra.mxu1 %vm1142_vm3, %v4931_v13 }
 0x1b1   : > { %4285 = vmatpush3.bf16.msra.mxu1 %v4578_v41  ;;  %4288 = vmatprep.mubr.msk.bf16.mxu1 %vm1142_vm3, %v4922_v57 }
 0x1b2   : > { %4286 = vmatprep.subr.bf16.mxu1 %v4579_v42 }
 0x1b5   : > { %4287 = vmatpush3.bf16.msra.mxu1 %v4579_v42 }
 0x1b6   : > { %4292 = vmatprep.subr.bf16.mxu1 %v4580_v43 }
 0x1b8   : > { %4289 = vmatmul.mubr.msk.bf16.vlgmr.msra.gmra.mxu1 %vm1142_vm3, %v4931_v13 }
 0x1b9   : > { %4293 = vmatpush3.bf16.msra.mxu1 %v4580_v43  ;;  %4296 = vmatprep.mubr.msk.bf16.mxu1 %vm1142_vm3, %v4918_v48 }
 0x1ba   : > { %4294 = vmatprep.subr.bf16.mxu1 %v4581_v46 }
 0x1bd   : > { %4295 = vmatpush3.bf16.msra.mxu1 %v4581_v46 }
 0x1be   : > { %4300 = vmatprep.subr.bf16.mxu1 %v4582_v49 }
 0x1c0   : > { %4297 = vmatmul.mubr.msk.bf16.vlgmr.msra.gmra.mxu1 %vm1142_vm3, %v4943_v20 }
 0x1c1   : > { %4301 = vmatpush3.bf16.msra.mxu1 %v4582_v49  ;;  %4304 = vmatprep.mubr.msk.bf16.mxu1 %vm1142_vm3, %v4918_v48 }
 0x1c2   : > { %4302 = vmatprep.subr.bf16.mxu1 %v4583_v33 }
 0x1c5   : > { %4303 = vmatpush3.bf16.msra.mxu1 %v4583_v33 }
 0x1c6   : > { %4308 = vmatprep.subr.bf16.mxu1 %v4584_v44 }
 0x1c8   : > { %4305 = vmatmul.mubr.msk.bf16.vlgmr.msra.gmra.mxu1 %vm1142_vm3, %v4943_v20 }
 0x1c9   : > { %4309 = vmatpush3.bf16.msra.mxu1 %v4584_v44  ;;  %4312 = vmatprep.mubr.msk.bf16.mxu1 %vm1142_vm3, %v4918_v48 }
 0x1ca   : > { %4310 = vmatprep.subr.bf16.mxu1 %v4585_v50 }
 0x1cd   : > { %4311 = vmatpush3.bf16.msra.mxu1 %v4585_v50 }
 0x1ce   : > { %4316 = vmatprep.subr.bf16.mxu1 %v4586_v51 }
 0x1d0   : > { %4313 = vmatmul.mubr.msk.bf16.vlgmr.msra.gmra.mxu1 %vm1142_vm3, %v4943_v20 }
 0x1d1   : > { %4317 = vmatpush3.bf16.msra.mxu1 %v4586_v51  ;;  %4320 = vmatprep.mubr.msk.bf16.mxu1 %vm1142_vm3, %v4918_v48 }
 0x1d2   : > { %4318 = vmatprep.subr.bf16.mxu1 %v4587_v52 }
 0x1d5   : > { %4319 = vmatpush3.bf16.msra.mxu1 %v4587_v52 }
 0x1d6   : > { %4324 = vmatprep.subr.bf16.mxu1 %v4588_v35 }
 0x1d8   : > { %4321 = vmatmul.mubr.msk.bf16.vlgmr.msra.gmra.mxu1 %vm1142_vm3, %v4943_v20 }
 0x1d9   : > { %4325 = vmatpush3.bf16.msra.mxu1 %v4588_v35  ;;  %4328 = vmatprep.mubr.msk.bf16.mxu1 %vm1142_vm3, %v4918_v48  ;;  %v4599_v48 = vld [vmem:[%s5349_s3 + $0x150] sm:$0xff]  }
 0x1da   : > { %4326 = vmatprep.subr.bf16.mxu1 %v4589_v45 }
 0x1dd   : > { %4327 = vmatpush3.bf16.msra.mxu1 %v4589_v45 }
 0x1de   : > { %4332 = vmatprep.subr.bf16.mxu1 %v4590_v58 }
 0x1e0   : > { %4329 = vmatmul.mubr.msk.bf16.vlgmr.msra.gmra.mxu1 %vm1142_vm3, %v4943_v20 }
 0x1e1   : > { %4333 = vmatpush3.bf16.msra.mxu1 %v4590_v58  ;;  %4336 = vmatprep.mubr.msk.bf16.mxu1 %vm1142_vm3, %v4931_v13 }
 0x1e2   : > { %4334 = vmatprep.subr.bf16.mxu1 %v4591_v59 }
 0x1e5   : > { %4335 = vmatpush3.bf16.msra.mxu1 %v4591_v59 }
 0x1e6   : > { %4340 = vmatprep.subr.bf16.mxu1 %v4592_v54 }
 0x1e8   : > { %4337 = vmatmul.mubr.msk.bf16.vlgmr.msra.gmra.mxu1 %vm1142_vm3, %v4945_v21 }
 0x1e9   : > { %4341 = vmatpush3.bf16.msra.mxu1 %v4592_v54  ;;  %4344 = vmatprep.mubr.msk.bf16.mxu1 %vm1142_vm3, %v4931_v13 }
 0x1ea   : > { %4342 = vmatprep.subr.bf16.mxu1 %v4593_v60 }
 0x1ed   : > { %4343 = vmatpush3.bf16.msra.mxu1 %v4593_v60 }
 0x1ee   : > { %4348 = vmatprep.subr.bf16.mxu1 %v4594_v55 }
 0x1f0   : > { %4345 = vmatmul.mubr.msk.bf16.vlgmr.msra.gmra.mxu1 %vm1142_vm3, %v4945_v21 }
 0x1f1   : > { %4349 = vmatpush3.bf16.msra.mxu1 %v4594_v55  ;;  %4352 = vmatprep.mubr.msk.bf16.mxu1 %vm1142_vm3, %v4931_v13 }
 0x1f2   : > { %4350 = vmatprep.subr.bf16.mxu1 %v4595_v61 }
 0x1f5   : > { %4351 = vmatpush3.bf16.msra.mxu1 %v4595_v61 }
 0x1f6   : > { %4364 = vmatprep.subr.bf16.mxu1 %v4596_v3 }
 0x1f8   : > { %4353 = vmatmul.mubr.msk.bf16.vlgmr.msra.gmra.mxu1 %vm1142_vm3, %v4945_v21 }
 0x1f9   : > { %4365 = vmatpush3.bf16.msra.mxu1 %v4596_v3  ;;  %4368 = vmatprep.mubr.msk.bf16.mxu1 %vm1142_vm3, %v4931_v13 }
 0x1fa   : > { %4366 = vmatprep.subr.bf16.mxu1 %v4597_v4 }
 0x1fd   : > { %4367 = vmatpush3.bf16.msra.mxu1 %v4597_v4 }
 0x1fe   : > { %4380 = vmatprep.subr.bf16.mxu1 %v4598_v39 }
 0x200   : > { %4369 = vmatmul.mubr.msk.bf16.vlgmr.msra.gmra.mxu1 %vm1142_vm3, %v4945_v21 }
 0x201   : > { %4381 = vmatpush3.bf16.msra.mxu1 %v4598_v39  ;;  %4384 = vmatprep.mubr.msk.bf16.mxu1 %vm1142_vm3, %v4943_v20 }
 0x202   : > { %4382 = vmatprep.subr.bf16.mxu1 %v4599_v48 }
 0x205   : > { %4383 = vmatpush3.bf16.msra.mxu1 %v4599_v48 }
 0x206   : > { %4396 = vmatprep.subr.bf16.mxu1 %v4600_v63 }
 0x208   : > { %4385 = vmatmul.mubr.msk.bf16.vlgmr.msra.gmra.mxu1 %vm1142_vm3, %v4941_v19 }
 0x209   : > { %4397 = vmatpush3.bf16.msra.mxu1 %v4600_v63  ;;  %4400 = vmatprep.mubr.msk.bf16.mxu1 %vm1142_vm3, %v4943_v20  ;;  %v4602_v63 = vld [vmem:[%s5351_s5 + $0x38] sm:$0xff]  }
 0x20a   : > { %4398 = vmatprep.subr.bf16.mxu1 %v4601_v0 }
 0x20d   : > { %4399 = vmatpush3.bf16.msra.mxu1 %v4601_v0  ;;  %v4603_v0 = vld [vmem:[%s5351_s5 + $0x18] sm:$0xff]  }
 0x210   : > { %4401 = vmatmul.mubr.msk.bf16.vlgmr.msra.gmra.mxu1 %vm1142_vm3, %v4941_v19 }
 0x230   : > { %v4218_v5 = vpop.f32.mrf.mxu1 }
 0x232   : > { %v1183_v6 = vpop.f32.mrf.mxu1 }
 0x234   : > { %v4219_v47 = vpop.f32.mrf.mxu1 }
 0x236   : > { %v1186_v56 = vpop.f32.mrf.mxu1 }
 0x238   : > { %v4226_v57 = vpop.f32.mrf.mxu1 }
 0x239   : > { %v1270_v7 = vrot.slane %v4226_v57, 1 }
 0x23a   : > { %v1249_v8 = vpop.f32.mrf.mxu1 }
 0x23b   : > { %v1278_v9 = vadd.f32 %v4218_v5, %v1270_v7  ;;  %v1268_v1 = vrot.slane %v1249_v8, 1 }
 0x23c   : > { %v4227_v2 = vpop.f32.mrf.mxu1 }
 0x23d   : > { %v1276_v10 = vadd.f32 %v1268_v1, %v1183_v6  ;;  %v1271_v11 = vrot.slane %v4227_v2, 1  ;;  %v4685_v6 = vmov 0.0   ;;  %v4605_v1 = vld [vmem:[%s5351_s5 + $0x10] sm:$0xff]  }
 0x23e   : > { %v1252_v12 = vpop.f32.mrf.mxu1  ;;  %4412 = vmatprep.subr.bf16.mxu1 %v4685_v6  ;;  %4424 = vmatprep.subr.bf16.mxu0 %v4685_v6 }
 0x23f   : > { %v1279_v13 = vadd.f32 %v4219_v47, %v1271_v11  ;;  %v1269_v14 = vrot.slane %v1252_v12, 1  ;;  %4413 = vmatpush3.bf16.msra.mxu1 %v4602_v63  ;;  %4425 = vmatpush3.bf16.msra.mxu0 %v4603_v0 }
 0x240   : > { %v4234_v15 = vpop.f32.mrf.mxu1  ;;  %4414 = vmatprep.subr.bf16.mxu1 %v4685_v6  ;;  %4426 = vmatprep.subr.bf16.mxu0 %v4685_v6 }
 0x241   : > { %v1277_v16 = vadd.f32 %v1269_v14, %v1186_v56  ;;  %v1352_v17 = vrot.slane %v4234_v15, 2  ;;  %v4607_v14 = vld [vmem:[%s5351_s5 + $0x8] sm:$0xff]   ;;  %4420 = vmatprep.mubr.msk.bf16.mxu1 %vm4686_vm4, %v4685_v6  ;;  %4432 = vmatprep.mubr.msk.bf16.mxu0 %vm4686_vm4, %v4685_v6 }
 0x242   : > { %v1331_v18 = vpop.f32.mrf.mxu1 }
 0x243   : > { %v1360_v19 = vadd.f32 %v1352_v17, %v1278_v9  ;;  %v1350_v20 = vrot.slane %v1331_v18, 2  ;;  %v4604_v9 = vld [vmem:[%s5351_s5 + $0x30] sm:$0xff]   ;;  %4427 = vmatpush3.bf16.msra.mxu0 %v4605_v1 }
 0x244   : > { %v4235_v21 = vpop.f32.mrf.mxu1  ;;  %4415 = vmatpush3.bf16.msra.mxu1 %v4604_v9  ;;  %4428 = vmatprep.subr.bf16.mxu0 %v4685_v6 }
 0x245   : > { %v1358_v53 = vadd.f32 %v1350_v20, %v1276_v10  ;;  %v1353_v22 = vrot.slane %v4235_v21, 2  ;;  %4416 = vmatprep.subr.bf16.mxu1 %v4685_v6  ;;  %v4608_v20 = vld [vmem:[%s5351_s5 + $0x20] sm:$0xff]  }
 0x246   : > { %v1334_v23 = vpop.f32.mrf.mxu1  ;;  %v4609_v21 = vld [vmem:[%s5351_s5] sm:$0xff]  }
 0x247   : > { %v1361_v24 = vadd.f32 %v1353_v22, %v1279_v13  ;;  %v1351_v62 = vrot.slane %v1334_v23, 2  ;;  %v4606_v13 = vld [vmem:[%s5351_s5 + $0x28] sm:$0xff]   ;;  %4429 = vmatpush3.bf16.msra.mxu0 %v4607_v14 }
 0x248   : > { %v4242_v26 = vpop.f32.mrf.mxu1  ;;  %4417 = vmatpush3.bf16.msra.mxu1 %v4606_v13  ;;  %4430 = vmatprep.subr.bf16.mxu0 %v4685_v6 }
 0x249   : > { %v1359_v28 = vadd.f32 %v1351_v62, %v1277_v16  ;;  %v1434_v25 = vrot.slane %v4242_v26, 3  ;;  %4418 = vmatprep.subr.bf16.mxu1 %v4685_v6 }
 0x24a   : > { %v1413_v27 = vpop.f32.mrf.mxu1 }
 0x24b   : > { %v1442_v30 = vadd.f32 %v1434_v25, %v1360_v19  ;;  %v1432_v29 = vrot.slane %v1413_v27, 3  ;;  %4431 = vmatpush3.bf16.msra.mxu0 %v4609_v21 }
 0x24c   : > { %v4243_v32 = vpop.f32.mrf.mxu1  ;;  %4419 = vmatpush3.bf16.msra.mxu1 %v4608_v20  ;;  %4448 = vmatprep.subr.bf16.mxu0 %v4685_v6 }
 0x24d   : > { %v1440_v34 = vadd.f32 %v1432_v29, %v1358_v53  ;;  %v1435_v36 = vrot.slane %v4243_v32, 3  ;;  %4436 = vmatprep.subr.bf16.mxu1 %v4685_v6 }
 0x24e   : > { %v1416_v31 = vpop.f32.mrf.mxu1 }
 0x24f   : > { %v1443_v37 = vadd.f32 %v1435_v36, %v1361_v24  ;;  %v1433_v38 = vrot.slane %v1416_v31, 3 }
 0x250   : > { %v4250_v40 = vpop.f32.mrf.mxu1 }
 0x251   : > { %v1441_v41 = vadd.f32 %v1433_v38, %v1359_v28  ;;  %v1516_v42 = vrot.slane %v4250_v40, 4 }
 0x252   : > { %v1495_v43 = vpop.f32.mrf.mxu1 }
 0x253   : > { %v1514_v46 = vrot.slane %v1495_v43, 4  ;;  %v1524_v49 = vadd.f32 %v1516_v42, %v1442_v30 }
 0x254   : > { %v4251_v33 = vpop.f32.mrf.mxu1 }
 0x255   : > { %v1517_v44 = vrot.slane %v4251_v33, 4  ;;  %v1522_v50 = vadd.f32 %v1514_v46, %v1440_v34 }
 0x256   : > { %v1498_v51 = vpop.f32.mrf.mxu1 }
 0x257   : > { %v1515_v52 = vrot.slane %v1498_v51, 4  ;;  %v1525_v35 = vadd.f32 %v1517_v44, %v1443_v37 }
 0x258   : > { %v4258_v45 = vpop.f32.mrf.mxu1 }
 0x259   : > { %v1602_v58 = vadd.f32 %v4258_v45, %v1524_v49  ;;  %v1523_v59 = vadd.f32 %v1515_v52, %v1441_v41 }
 0x25a   : > { %v1585_v54 = vpop.f32.mrf.mxu1 }
 0x25b   : > { %v1600_v60 = vadd.f32 %v1585_v54, %v1522_v50 }
 0x25c   : > { %v4259_v55 = vpop.f32.mrf.mxu1 }
 0x25d   : > { %v1603_v61 = vadd.f32 %v4259_v55, %v1525_v35 }
 0x25e   : > { %v1588_v3 = vpop.f32.mrf.mxu1 }
 0x25f   : > { %v1601_v4 = vadd.f32 %v1588_v3, %v1523_v59 }
 0x260   : > { %v4266_v39 = vpop.f32.mrf.mxu1 }
 0x261   : > { %v1676_v48 = vrot.slane %v4266_v39, 1 }
 0x262   : > { %v1655_v5 = vpop.f32.mrf.mxu1 }
 0x263   : > { %v1684_v47 = vadd.f32 %v1676_v48, %v1602_v58  ;;  %v1674_v56 = vrot.slane %v1655_v5, 1 }
 0x264   : > { %v4267_v57 = vpop.f32.mrf.mxu1 }
 0x265   : > { %v1682_v7 = vadd.f32 %v1674_v56, %v1600_v60  ;;  %v1677_v8 = vrot.slane %v4267_v57, 1 }
 0x266   : > { %v1658_v2 = vpop.f32.mrf.mxu1 }
 0x267   : > { %v1685_v10 = vadd.f32 %v1677_v8, %v1603_v61  ;;  %v1675_v11 = vrot.slane %v1658_v2, 1  ;;  %v5204_v2 = vpop.f32.mrf.mxu0 }
 0x268   : > { %v4274_v12 = vpop.f32.mrf.mxu1 }
 0x269   : > { %v1683_v15 = vadd.f32 %v1675_v11, %v1601_v4  ;;  %v1758_v16 = vrot.slane %v4274_v12, 2  ;;  %v5206_v12 = vpop.f32.mrf.mxu0 }
 0x26a   : > { %v1737_v17 = vpop.f32.mrf.mxu1 }
 0x26b   : > { %v1766_v18 = vadd.f32 %v1758_v16, %v1684_v47  ;;  %v1756_v19 = vrot.slane %v1737_v17, 2 }
 0x26c   : > { %v4275_v53 = vpop.f32.mrf.mxu1 }
 0x26d   : > { %v1764_v22 = vadd.f32 %v1756_v19, %v1682_v7  ;;  %v1759_v23 = vrot.slane %v4275_v53, 2 }
 0x26e   : > { %v1740_v24 = vpop.f32.mrf.mxu1 }
 0x26f   : > { %v1767_v62 = vadd.f32 %v1759_v23, %v1685_v10  ;;  %v1757_v26 = vrot.slane %v1740_v24, 2 }
 0x270   : > { %v4282_v28 = vpop.f32.mrf.mxu1 }
 0x271   : > { %v1765_v25 = vadd.f32 %v1757_v26, %v1683_v15  ;;  %v1840_v27 = vrot.slane %v4282_v28, 3  ;;  %v5208_v15 = vpop.f32.mrf.mxu0 }
 0x272   : > { %v1819_v30 = vpop.f32.mrf.mxu1 }
 0x273   : > { %v1848_v29 = vadd.f32 %v1840_v27, %v1766_v18  ;;  %v1838_v32 = vrot.slane %v1819_v30, 3  ;;  %v5210_v18 = vpop.f32.mrf.mxu0 }
 0x274   : > { %v4283_v34 = vpop.f32.mrf.mxu1 }
 0x275   : > { %v1846_v36 = vadd.f32 %v1838_v32, %v1764_v22  ;;  %v1841_v31 = vrot.slane %v4283_v34, 3  ;;  %v5212_v21 = vpop.f32.mrf.mxu0 }
 0x276   : > { %v1822_v37 = vpop.f32.mrf.mxu1 }
 0x277   : > { %v1849_v38 = vadd.f32 %v1841_v31, %v1767_v62  ;;  %v1839_v40 = vrot.slane %v1822_v37, 3  ;;  %v5214_v23 = vpop.f32.mrf.mxu0 }
 0x278   : > { %v4290_v41 = vpop.f32.mrf.mxu1 }
 0x279   : > { %v1847_v42 = vadd.f32 %v1839_v40, %v1765_v25  ;;  %v1922_v43 = vrot.slane %v4290_v41, 4  ;;  %v5216_v26 = vpop.f32.mrf.mxu0 }
 0x27a   : > { %v1901_v46 = vpop.f32.mrf.mxu1 }
 0x27b   : > { %v1920_v49 = vrot.slane %v1901_v46, 4  ;;  %v1930_v33 = vadd.f32 %v1922_v43, %v1848_v29 }
 0x27c   : > { %v4291_v44 = vpop.f32.mrf.mxu1 }
 0x27d   : > { %v1923_v50 = vrot.slane %v4291_v44, 4  ;;  %v1928_v51 = vadd.f32 %v1920_v49, %v1846_v36  ;;  %v5218_v36 = vpop.f32.mrf.mxu0 }
 0x27e   : > { %v1904_v52 = vpop.f32.mrf.mxu1 }
 0x27f   : > { %v1931_v35 = vadd.f32 %v1923_v50, %v1849_v38  ;;  %v1921_v28 = vrot.slane %v1904_v52, 4 }
 0x280   : > { %v4298_v45 = vpop.f32.mrf.mxu1 }
 0x281   : > { %v2004_v58 = vadd.f32 %v4298_v45, %v1930_v33  ;;  %v1929_v31 = vadd.f32 %v1921_v28, %v1847_v42 }
 0x282   : > { %v1987_v59 = vpop.f32.mrf.mxu1 }
 0x283   : > { %v2002_v29 = vadd.f32 %v1987_v59, %v1928_v51 }
 0x284   : > { %v4299_v54 = vpop.f32.mrf.mxu1 }
 0x285   : > { %v2005_v60 = vadd.f32 %v4299_v54, %v1931_v35 }
 0x286   : > { %v1990_v55 = vpop.f32.mrf.mxu1 }
 0x287   : > { %v2003_v49 = vadd.f32 %v1990_v55, %v1929_v31 }
 0x288   : > { %v4306_v61 = vpop.f32.mrf.mxu1 }
 0x289   : > { %v2078_v3 = vrot.slane %v4306_v61, 1 }
 0x28a   : > { %v2057_v4 = vpop.f32.mrf.mxu1 }
 0x28b   : > { %v2086_v39 = vadd.f32 %v2078_v3, %v2004_v58  ;;  %v2076_v27 = vrot.slane %v2057_v4, 1  ;;  %v5220_v58 = vpop.f32.mrf.mxu0 }
 0x28c   : > { %v4307_v48 = vpop.f32.mrf.mxu1 }
 0x28d   : > { %v2079_v63 = vrot.slane %v4307_v48, 1  ;;  %v2084_v41 = vadd.f32 %v2076_v27, %v2002_v29 }
 0x28e   : > { %v2060_v0 = vpop.f32.mrf.mxu1 }
 0x28f   : > { %v2087_v5 = vadd.f32 %v2079_v63, %v2005_v60  ;;  %v2077_v37 = vrot.slane %v2060_v0, 1 }
 0x290   : > { %v4314_v47 = vpop.f32.mrf.mxu1 }
 0x291   : > { %v2160_v56 = vrot.slane %v4314_v47, 2  ;;  %v2085_v51 = vadd.f32 %v2077_v37, %v2003_v49 }
 0x292   : > { %v2139_v57 = vpop.f32.mrf.mxu1 }
 0x293   : > { %v2168_v7 = vadd.f32 %v2160_v56, %v2086_v39  ;;  %v2158_v32 = vrot.slane %v2139_v57, 2 }
 0x294   : > { %v4315_v8 = vpop.f32.mrf.mxu1 }
 0x295   : > { %v2161_v38 = vrot.slane %v4315_v8, 2  ;;  %v2166_v52 = vadd.f32 %v2158_v32, %v2084_v41 }
 0x296   : > { %v2142_v9 = vpop.f32.mrf.mxu1 }
 0x297   : > { %v2159_v33 = vrot.slane %v2142_v9, 2  ;;  %v2169_v59 = vadd.f32 %v2161_v38, %v2087_v5 }
 0x298   : > { %v4322_v1 = vpop.f32.mrf.mxu1 }
 0x299   : > { %v2242_v34 = vrot.slane %v4322_v1, 3  ;;  %v2167_v39 = vadd.f32 %v2159_v33, %v2085_v51 }
 0x29a   : > { %v2221_v10 = vpop.f32.mrf.mxu1 }
 0x29b   : > { %v2240_v43 = vrot.slane %v2221_v10, 3  ;;  %v2250_v35 = vadd.f32 %v2242_v34, %v2168_v7  ;;  %v5222_v7 = vpop.f32.mrf.mxu0 }
 0x29c   : > { %v4323_v11 = vpop.f32.mrf.mxu1 }
 0x29d   : > { %v2243_v44 = vrot.slane %v4323_v11, 3  ;;  %v2248_v61 = vadd.f32 %v2240_v43, %v2166_v52  ;;  %v2643_v52 = vrot.slane %v5210_v18, 3 }
 0x29e   : > { %v2224_v13 = vpop.f32.mrf.mxu1 }
 0x29f   : > { %v2241_v54 = vrot.slane %v2224_v13, 3  ;;  %v2251_v48 = vadd.f32 %v2243_v44, %v2169_v59 }
 0x2a0   : > { %v4330_v14 = vpop.f32.mrf.mxu1 }
 0x2a1   : > { %v2324_v46 = vrot.slane %v4330_v14, 4  ;;  %v2249_v8 = vadd.f32 %v2241_v54, %v2167_v39 }
 0x2a2   : > { %v2303_v16 = vpop.f32.mrf.mxu1 }
 0x2a3   : > { %v2322_v45 = vrot.slane %v2303_v16, 4  ;;  %v2332_v3 = vadd.f32 %v2324_v46, %v2250_v35 }
 0x2a4   : > { %v4331_v17 = vpop.f32.mrf.mxu1 }
 0x2a5   : > { %v2325_v60 = vrot.slane %v4331_v17, 4  ;;  %v2330_v47 = vadd.f32 %v2322_v45, %v2248_v61 }
 0x2a6   : > { %v2306_v19 = vpop.f32.mrf.mxu1 }
 0x2a7   : > { %v2323_v63 = vrot.slane %v2306_v19, 4  ;;  %v2333_v9 = vadd.f32 %v2325_v60, %v2251_v48 }
 0x2a8   : > { %v4338_v20 = vpop.f32.mrf.mxu1 }
 0x2a9   : > { %v2406_v0 = vadd.f32 %v4338_v20, %v2332_v3  ;;  %v2331_v16 = vadd.f32 %v2323_v63, %v2249_v8  ;;  %v2644_v20 = vrot.slane %v5204_v2, 3 }
 0x2aa   : > { %v2389_v53 = vpop.f32.mrf.mxu1 }
 0x2ab   : > { %v2404_v5 = vadd.f32 %v2389_v53, %v2330_v47  ;;  %v2642_v53 = vrot.slane %v5206_v12, 3  ;;  %v2964_v47 = vrot.slane %v5220_v58, 2 }
 0x2ac   : > { %v4339_v22 = vpop.f32.mrf.mxu1 }
 0x2ad   : > { %v2407_v14 = vadd.f32 %v4339_v22, %v2333_v9  ;;  %v2962_v9 = vrot.slane %v5222_v7, 2 }
 0x2ae   : > { %v2392_v24 = vpop.f32.mrf.mxu1 }
 0x2af   : > { %v2405_v29 = vadd.f32 %v2392_v24, %v2331_v16 }
 0x2b0   : > { %v4346_v62 = vpop.f32.mrf.mxu1 }
 0x2b1   : > { %v2480_v4 = vrot.slane %v4346_v62, 1 }
 0x2b2   : > { %v2459_v25 = vpop.f32.mrf.mxu1 }
 0x2b3   : > { %v2478_v56 = vrot.slane %v2459_v25, 1  ;;  %v2488_v10 = vadd.f32 %v2480_v4, %v2406_v0  ;;  %v4395_v25 = vpop.f32.mrf.mxu0 }
 0x2b4   : > { %v4347_v30 = vpop.f32.mrf.mxu1 }
 0x2b5   : > { %v2481_v11 = vrot.slane %v4347_v30, 1  ;;  %v2486_v62 = vadd.f32 %v2478_v56, %v2404_v5  ;;  %v2946_v49 = vpop.f32.mrf.mxu0 }
 0x2b6   : > { %v2462_v40 = vpop.f32.mrf.mxu1  ;;  %v2963_v58 = vrot.slane %v2946_v49, 2 }
 0x2b7   : > { %v2479_v28 = vrot.slane %v2462_v40, 1  ;;  %v2489_v34 = vadd.f32 %v2481_v11, %v2407_v14  ;;  %v2645_v40 = vrot.slane %v5208_v15, 3  ;;  %v4410_v54 = vpop.f32.mrf.mxu0 }
 0x2b8   : > { %v4354_v50 = vpop.f32.mrf.mxu1 }
 0x2b9   : > { %v2562_v57 = vrot.slane %v4354_v50, 2  ;;  %v2487_v41 = vadd.f32 %v2479_v28, %v2405_v29  ;;  %v3107_v0 = vpop.f32.mrf.mxu0 }
 0x2ba   : > { %v2541_v42 = vpop.f32.mrf.mxu1  ;;  %v3126_v7 = vrot.slane %v3107_v0, 4 }
 0x2bb   : > { %v2560_v13 = vrot.slane %v2541_v42, 2  ;;  %v2570_v19 = vadd.f32 %v2562_v57, %v2488_v10  ;;  %v4411_v14 = vpop.f32.mrf.mxu0 }
 0x2bc   : > { %v4355_v55 = vpop.f32.mrf.mxu1 }
 0x2bd   : > { %v2563_v27 = vrot.slane %v4355_v55, 2  ;;  %v2568_v31 = vadd.f32 %v2560_v13, %v2486_v62  ;;  %v2652_v43 = vadd.f32 %v2644_v20, %v2570_v19  ;;  %v2965_v13 = vrot.slane %v4395_v25, 2 }
 0x2be   : > { %v2544_v1 = vpop.f32.mrf.mxu1 }
 0x2bf   : > { %v2561_v37 = vrot.slane %v2544_v1, 2  ;;  %v2571_v22 = vadd.f32 %v2563_v27, %v2489_v34  ;;  %v2650_v50 = vadd.f32 %v2642_v53, %v2568_v31  ;;  %v3128_v27 = vrot.slane %v4410_v54, 4  ;;  %v3110_v34 = vpop.f32.mrf.mxu0  ;;  %v3920_v53 = vld [vmem:[%s5350_s4] ss:$0 sm:$0xff] }
 0x2c0   : > { %v4370_v17 = vpop.f32.mrf.mxu1 }
 0x2c1   : > { %v2726_v38 = vrot.slane %v4370_v17, 4  ;;  %v2569_v44 = vadd.f32 %v2561_v37, %v2487_v41  ;;  %v2653_v51 = vadd.f32 %v2645_v40, %v2571_v22 }
 0x2c2   : > { %v2705_v32 = vpop.f32.mrf.mxu1 }
 0x2c3   : > { %v2724_v46 = vrot.slane %v2705_v32, 4  ;;  %v2734_v2 = vadd.f32 %v2726_v38, %v2652_v43  ;;  %v2651_v61 = vadd.f32 %v2643_v52, %v2569_v44  ;;  %v3129_v32 = vrot.slane %v4411_v14, 4  ;;  %v4613_v14 = vld [vmem:[%s5351_s5 + $0x70] sm:$0xff]  }
 0x2c4   : > { %v4371_v30 = vpop.f32.mrf.mxu1 }
 0x2c5   : > { %v2727_v24 = vrot.slane %v4371_v30, 4  ;;  %v2732_v45 = vadd.f32 %v2724_v46, %v2650_v50  ;;  %v2808_v3 = vadd.f32 %v5212_v21, %v2734_v2  ;;  %v3127_v30 = vrot.slane %v3110_v34, 4  ;;  %v4619_v34 = vld [vmem:[%s5353_s7 + $0x10] sm:$0xff]  }
 0x2c6   : > { %v2708_v33 = vpop.f32.mrf.mxu1 }
 0x2c7   : > { %v2725_v59 = vrot.slane %v2708_v33, 4  ;;  %v2735_v42 = vadd.f32 %v2727_v24, %v2653_v51  ;;  %v2806_v63 = vadd.f32 %v5214_v23, %v2732_v45 }
 0x2c8   : > { %v4386_v35 = vpop.f32.mrf.mxu1 }
 0x2c9   : > { %v2882_v12 = vrot.slane %v4386_v35, 1  ;;  %v2733_v39 = vadd.f32 %v2725_v59, %v2651_v61  ;;  %v2809_v57 = vadd.f32 %v5216_v26, %v2735_v42 }
 0x2ca   : > { %v2861_v60 = vpop.f32.mrf.mxu1 }
 0x2cb   : > { %v2880_v15 = vrot.slane %v2861_v60, 1  ;;  %v2890_v48 = vadd.f32 %v2882_v12, %v2808_v3  ;;  %v2807_v21 = vadd.f32 %v5218_v36, %v2733_v39 }
 0x2cc   : > { %v4387_v4 = vpop.f32.mrf.mxu1 }
 0x2cd   : > { %v2883_v55 = vrot.slane %v4387_v4, 1  ;;  %v2888_v56 = vadd.f32 %v2880_v15, %v2806_v63  ;;  %v2972_v10 = vadd.f32 %v2964_v47, %v2890_v48 }
 0x2ce   : > { %v2864_v18 = vpop.f32.mrf.mxu1 }
 0x2cf   : > { %v2881_v8 = vrot.slane %v2864_v18, 1  ;;  %v2891_v5 = vadd.f32 %v2883_v55, %v2809_v57  ;;  %v2970_v62 = vadd.f32 %v2962_v9, %v2888_v56  ;;  %v4610_v9 = vld [vmem:[%s5351_s5 + $0x58] sm:$0xff]  }
 0x2d0   : > { %v4402_v1 = vpop.f32.mrf.mxu1 }
 0x2d1   : > { %v3046_v11 = vrot.slane %v4402_v1, 3  ;;  %v2889_v16 = vadd.f32 %v2881_v8, %v2807_v21  ;;  %v2973_v20 = vadd.f32 %v2965_v13, %v2891_v5  ;;  %v4611_v1 = vld [vmem:[%s5351_s5 + $0x78] sm:$0xff]   ;;  %v4612_v13 = vld [vmem:[%s5351_s5 + $0x50] sm:$0xff]  }
 0x2d2   : > { %v3025_v23 = vpop.f32.mrf.mxu1 }
 0x2d3   : > { %v3054_v17 = vadd.f32 %v3046_v11, %v2972_v10  ;;  %v3044_v28 = vrot.slane %v3025_v23, 3  ;;  %v2971_v38 = vadd.f32 %v2963_v58, %v2889_v16 }
 0x2d4   : > { %v4403_v19 = vpop.f32.mrf.mxu1 }
 0x2d5   : > { %v3052_v26 = vadd.f32 %v3044_v28, %v2970_v62  ;;  %v3047_v29 = vrot.slane %v4403_v19, 3  ;;  %v3136_v36 = vadd.f32 %v3128_v27, %v3054_v17  ;;  %v4614_v17 = vld [vmem:[%s5351_s5 + $0x48] sm:$0xff]   ;;  %v4616_v19 = vld [vmem:[%s5351_s5 + $0x40] sm:$0xff]  }
 0x2d6   : > { %v3028_v31 = vpop.f32.mrf.mxu1  ;;  %v4615_v62 = vld [vmem:[%s5351_s5 + $0x68] sm:$0xff]   ;;  %v4617_v27 = vld [vmem:[%s5351_s5 + $0x60] sm:$0xff]  }
 0x2d7   : > { %v3055_v37 = vadd.f32 %v3047_v29, %v2973_v20  ;;  %v3045_v25 = vrot.slane %v3028_v31, 3  ;;  %v3134_v41 = vadd.f32 %v3126_v7, %v3052_v26  ;;  %v3147_v46 = vadd.f32 %v3920_v53, %v3136_v36  ;;  %v4620_v31 = vld [vmem:[%s5353_s7 + $0x8] sm:$0xff]   ;;  %v4621_v36 = vld [vmem:[%s5353_s7] sm:$0xff]  }
 0x2d9   : > { %v3137_v22 = vadd.f32 %v3129_v32, %v3055_v37  ;;  %v3053_v43 = vadd.f32 %v3045_v25, %v2971_v38  ;;  %v3145_v33 = vadd.f32 %v3920_v53, %v3134_v41  ;;  %v4618_v32 = vld [vmem:[%s5353_s7 + $0x18] sm:$0xff]  }
 0x2db   : > { %v3148_v40 = vadd.f32 %v3920_v53, %v3137_v22  ;;  %v3135_v49 = vadd.f32 %v3127_v30, %v3053_v43 }
 0x2dd   : > { %v3322_v44 = vmax.f32 %v3147_v46, %v3148_v40  ;;  %v3146_v2 = vadd.f32 %v3920_v53, %v3135_v49 }
 0x2df   : > { %v3149_v50 = vmax.f32 %v3145_v33, %v3146_v2  ;;  %v3323_v24 = vsel %vm3150_vm5, %v3322_v44, -inf  ;;  %v3409_v52 = vsel %vm3168_vm6, %v3322_v44, -inf }
 0x2e0   : > { %v3324_v12 = vrot.slane %v3323_v24, 4  ;;  %v3410_v54 = vrot.slane %v3409_v52, 4 }
 0x2e1   : > { %v3151_v35 = vsel %vm3150_vm5, %v3149_v50, -inf  ;;  %v3169_v45 = vsel %vm3168_vm6, %v3149_v50, -inf }
 0x2e2   : > { %v3152_v51 = vrot.slane %v3151_v35, 4  ;;  %v3170_v59 = vrot.slane %v3169_v45, 4  ;;  %v3325_v15 = vmax.f32 %v3323_v24, %v3324_v12  ;;  %v3411_v4 = vmax.f32 %v3409_v52, %v3410_v54  ;;  %v3507_v54 = vld [vmem:[%s5354_s8] sm:$0x1] }
 0x2e4   : > { %v3153_v60 = vmax.f32 %v3151_v35, %v3152_v51  ;;  %v3171_v42 = vmax.f32 %v3169_v45, %v3170_v59  ;;  %v3326_v0 = vrot.slane %v3325_v15, 2  ;;  %v3412_v18 = vrot.slane %v3411_v4, 2 }
 0x2e6   : > { %v3154_v61 = vrot.slane %v3153_v60, 2  ;;  %v3172_v3 = vrot.slane %v3171_v42, 2  ;;  %v3327_v5 = vmax.f32 %v3325_v15, %v3326_v0  ;;  %v3413_v21 = vmax.f32 %v3411_v4, %v3412_v18 }
 0x2e8   : > { %v3155_v39 = vmax.f32 %v3153_v60, %v3154_v61  ;;  %v3173_v48 = vmax.f32 %v3171_v42, %v3172_v3  ;;  %v3328_v23 = vrot.slane %v3327_v5, 1  ;;  %v3414_v16 = vrot.slane %v3413_v21, 1 }
 0x2ea   : > { %v3174_v63 = vrot.slane %v3173_v48, 1  ;;  %v3156_v55 = vrot.slane %v3155_v39, 1  ;;  %v3329_v28 = vmax.f32 %v3327_v5, %v3328_v23  ;;  %v3415_v58 = vmax.f32 %v3413_v21, %v3414_v16 }
 0x2ec   : > { %v3175_v47 = vmax.f32 %v3173_v48, %v3174_v63  ;;  %v3157_v56 = vmax.f32 %v3155_v39, %v3156_v55  ;;  %v3330_v26 = vmax.f32 %v3329_v28, 0.0  ;;  %v3416_v20 = vmax.f32 %v3415_v58, 0.0 }
 0x2ee   : > { %v3176_v57 = vmax.f32 %v3175_v47, 0.0  ;;  %v3158_v8 = vmax.f32 %v3157_v56, 0.0  ;;  %v3331_v29 = vpack.c.bf16 %v3330_v26, %v3330_v26  ;;  %v3417_v7 = vpack.c.bf16 %v3416_v20, %v3416_v20 }
 0x2f0   : > { %v3177_v10 = vpack.c.bf16 %v3176_v57, %v3176_v57  ;;  %v3159_v11 = vpack.c.bf16 %v3158_v8, %v3158_v8 }
 0x2f2   : > { %4421 = vmatmul.mubr.msk.bf16.vlgmr.msra.gmra.mxu1 %vm3211_vm7, %v3177_v10  ;;  %4433 = vmatmul.mubr.msk.bf16.vlgmr.msra.gmra.mxu0 %vm3211_vm7, %v3159_v11 }
 0x2f3   : > { %4437 = vmatpush3.bf16.msra.mxu1 %v4610_v9  ;;  %4449 = vmatpush3.bf16.msra.mxu0 %v4611_v1 }
 0x2f4   : > { %4438 = vmatprep.subr.bf16.mxu1 %v4685_v6  ;;  %4450 = vmatprep.subr.bf16.mxu0 %v4685_v6 }
 0x2f5   : > { %4444 = vmatprep.mubr.msk.bf16.mxu1 %vm4686_vm4, %v4685_v6  ;;  %4456 = vmatprep.mubr.msk.bf16.mxu0 %vm4686_vm4, %v4685_v6 }
 0x2f7   : > { %4439 = vmatpush3.bf16.msra.mxu1 %v4612_v13  ;;  %4451 = vmatpush3.bf16.msra.mxu0 %v4613_v14 }
 0x2f8   : > { %4440 = vmatprep.subr.bf16.mxu1 %v4685_v6  ;;  %4452 = vmatprep.subr.bf16.mxu0 %v4685_v6 }
 0x2fb   : > { %4441 = vmatpush3.bf16.msra.mxu1 %v4614_v17  ;;  %4453 = vmatpush3.bf16.msra.mxu0 %v4615_v62 }
 0x2fc   : > { %4442 = vmatprep.subr.bf16.mxu1 %v4685_v6  ;;  %4454 = vmatprep.subr.bf16.mxu0 %v4685_v6 }
 0x2ff   : > { %4443 = vmatpush3.bf16.msra.mxu1 %v4616_v19  ;;  %4455 = vmatpush3.bf16.msra.mxu0 %v4617_v27 }
 0x300   : > { %4460 = vmatprep.subr.bf16.mxu1 %v4685_v6 }
 0x302   : > { %4445 = vmatmul.mubr.msk.bf16.vlgmr.msra.gmra.mxu1 %vm3211_vm7, %v3331_v29  ;;  %4457 = vmatmul.mubr.msk.bf16.vlgmr.msra.gmra.mxu0 %vm3211_vm7, %v3417_v7 }
 0x303   : > { %4468 = vmatprep.mubr.msk.bf16.mxu1 %vm4686_vm4, %v4685_v6  ;;  %4461 = vmatpush3.bf16.msra.mxu1 %v4618_v32 }
 0x304   : > { %4462 = vmatprep.subr.bf16.mxu1 %v4685_v6 }
 0x307   : > { %4463 = vmatpush3.bf16.msra.mxu1 %v4619_v34 }
 0x308   : > { %4464 = vmatprep.subr.bf16.mxu1 %v4685_v6 }
 0x30b   : > { %4465 = vmatpush3.bf16.msra.mxu1 %v4620_v31 }
 0x30c   : > { %4466 = vmatprep.subr.bf16.mxu1 %v4685_v6  ;;  %v3495_v6 = vld [vmem:[%s5352_s6] sm:$0x1] }
 0x30f   : > { %4467 = vmatpush3.bf16.msra.mxu1 %v4621_v36 }
 0x3b2   : > { %v3249_v37 = vpop.f32.mrf.mxu1  ;;  %v3316_v38 = vpop.f32.mrf.mxu0 }
 0x3b3   : > { %v3317_v46 = vadd.f32 %v3316_v38, %v3249_v37 }
 0x3b4   : > { %v4422_v25 = vpop.f32.mrf.mxu1  ;;  %v4434_v53 = vpop.f32.mrf.mxu0 }
 0x3b6   : > { %v3252_v30 = vpop.f32.mrf.mxu1  ;;  %v3319_v41 = vpop.f32.mrf.mxu0 }
 0x3b8   : > { %v4423_v22 = vpop.f32.mrf.mxu1  ;;  %v4435_v43 = vpop.f32.mrf.mxu0 }
 0x3c2   : > { %v3402_v40 = vpop.f32.mrf.mxu1  ;;  %v3488_v49 = vpop.f32.mrf.mxu0 }
 0x3c3   : > { %v3408_v33 = vadd.f32 %v3402_v40, %v3317_v46 }
 0x3c4   : > { %v4446_v44 = vpop.f32.mrf.mxu1  ;;  %v4458_v2 = vpop.f32.mrf.mxu0 }
 0x3c5   : > { %v3494_v50 = vadd.f32 %v3488_v49, %v3408_v33 }
 0x3c6   : > { %v3405_v24 = vpop.f32.mrf.mxu1  ;;  %v3491_v52 = vpop.f32.mrf.mxu0 }
 0x3c7   : > { %v3496_v35 = vadd.f32 %v3495_v6, %v3494_v50 }
 0x3c8   : > { %v4447_v45 = vpop.f32.mrf.mxu1  ;;  %v4459_v51 = vpop.f32.mrf.mxu0 }
 0x3c9   : > { %v3497_v59 = vmax.f32 %v3496_v35, 0.0 }
 0x3cb   : > { %v3498_v12 = vpack.c.bf16 %v3497_v59, %v3497_v59 }
 0x3cd   : > { %4469 = vmatmul.mubr.msk.bf16.vlgmr.msra.gmra.mxu1 %vm3211_vm7, %v3498_v12 }
 0x48d   : > { %v3569_v60 = vpop.f32.mrf.mxu1 }
 0x48e   : > { %v3570_v42 = vadd.f32 %v3569_v60, %v3507_v54 }
 0x48f   : > { %v4470_v61 = vpop.f32.mrf.mxu1 }
 0x490   : > { %3575 = vst [vmem:[%s325_s24] sm:$0x1] %v3570_v42 }
 0x491   : > { %v3572_v3 = vpop.f32.mrf.mxu1 }
 0x492   : > { %4635 = shalt.err (!%p4632_p3)
}
 0x493   : > { %s4636_s22 = scalar_lea.hbm %s5305_s28, 16  ;;  %s4640_s24 = scalar_lea.hbm %s5355_s9, 32 }
 0x494   : > { %p4637_p4 = scmp.ne.s32.totalorder %s5305_s28, %s4636_s22  ;;  %p4641_p9 = scmp.lt.s32.totalorder %s5305_s28, %s5355_s9 }
 0x495   : > { %p4642_p10 = scmp.lt.s32.totalorder %s4640_s24, %s4636_s22 }
 0x496   : > { %p4638_p7 = pnand %p4637_p4, %p4776_p5 }
 0x497   : > { %p4643_p11 = por %p4642_p10, %p4641_p9 }
 0x498   : > { %p4639_p8 = pneg %p4638_p7 }
 0x49a   : > { %p4644_p12 = pnand %p4643_p11, %p4639_p8 }
 0x49c   : > { %4647 = shalt.err (!%p4644_p12)
}
 0x49d   : > { %4472 = dma.vmem_to_hbm [thread:$0]  (%p4776_p5), %s5307_s25, 16, %s5305_s28, %s3577_s29   ;;  %v4471_v15 = vpop.f32.mrf.mxu1 }
 0x49e PF: > { %p4478_p13 = scmp.ge.s32.totalorder %s4682_s12, 2  ;;  %s3601_s14 = sand.u32 1, %s4670_s30  }
 0x49f   : > { %s3602_s13 = scalar_lea.sflag [#allocation3], %s3601_s14 }
 0x4a0   : > { %p4475_p0 = pnand %p4478_p13, %p4780_p6 }
 0x4a2   : > { %p4476_p1 = pneg %p4475_p0 }
 0x4a4   : > { %4665 = dma.done.wait (%p4476_p1), %s3602_s13, 16  }
 0x4a5   : > { %4667 = vsyncadd (%p4476_p1), %s3602_s13, 4294967280  ;;  %p19_p2 = scmp.ge.s32.totalorder %s4763_s15, 4   ;;  %s5358_s30 = smov %s4674_s10 }
 0x4a6   : > { %s5359_s10 = smov %s4678_s11  ;;  %s5360_s11 = smov %s4774_s18 }
 0x4a7   : > { %s5361_s12 = smov %s4763_s15  ;;  %21 = sbr.rel (!%p19_p2) target bundleno = 3 (0x3), region = 118 }
 0x4ac   :  { %3606 = vsyncpa [#allocation3], 1 }
 0x4ad   :  { %3608 = vsyncpa [#allocation3 + $0x1], 1 }

</bundles_post_ra>
